<compile_context>
chip_gen: v5e
topology: v5e:2x2
jax: 0.10.0
libtpu: 0.0.40
codegen_flags: <defaults>
</compile_context>

<pallas_src>
import jax
import jax.numpy as jnp
from jax.experimental import pallas as pl
from jax.experimental.pallas import tpu as pltpu

EPS = 1e-5


def attdest_kernel(diff_ref, agts_ref, w1_ref, vec_ref,
                   w2_ref, w3a_ref, w3b_ref, out_ref):
    n_agt = agts_ref.shape[-1]
    num_mods = diff_ref.shape[-1] // 2
    inv_n = 1.0 / n_agt

    # packed per-channel vectors: rows = [b1, g2, be2, g3, be3, pad...]
    b1 = vec_ref[0:1, :]
    g2 = vec_ref[1:2, :]
    be2 = vec_ref[2:3, :]
    g3 = vec_ref[3:4, :]
    be3 = vec_ref[4:5, :]

    w1x = w1_ref[0:1, :]
    w1y = w1_ref[1:2, :]
    w2 = w2_ref[...]
    w3a = w3a_ref[...]

    # agts @ W3b computed ONCE per agent block (shared by all num_mods modes).
    agts = agts_ref[...]
    zb = jnp.dot(agts, w3b_ref[...], preferred_element_type=jnp.float32)  # (ta, n_agt)

    for m in range(num_mods):  # static, small (4-6) -> unrolled
        dx = diff_ref[:, 2 * m:2 * m + 1]       # (ta, 1)
        dy = diff_ref[:, 2 * m + 1:2 * m + 2]   # (ta, 1)

        # --- Linear(2, n_agt, bias=True) + ReLU : kept on the VPU ----------
        h1 = jnp.maximum(dx * w1x + dy * w1y + b1, 0.0)          # (ta, n_agt)

        # --- Linear(n_agt, n_agt, bias=False) + GroupNorm(1) + ReLU --------
        h2 = jnp.dot(h1.astype(w2.dtype), w2,
                     preferred_element_type=jnp.float32)
        s1 = jnp.sum(h2, axis=-1, keepdims=True)
        s2 = jnp.sum(h2 * h2, axis=-1, keepdims=True)
        mu = s1 * inv_n
        var = jnp.maximum(s2 * inv_n - mu * mu, 0.0)
        h2 = jnp.maximum((h2 - mu) * jax.lax.rsqrt(var + EPS) * g2 + be2, 0.0)

        # --- concat([dist, agts]) @ W3.T == h2 @ W3a.T + agts @ W3b.T ------
        h3 = jnp.dot(h2.astype(w3a.dtype), w3a,
                     preferred_element_type=jnp.float32) + zb
        s1 = jnp.sum(h3, axis=-1, keepdims=True)
        s2 = jnp.sum(h3 * h3, axis=-1, keepdims=True)
        mu = s1 * inv_n
        var = jnp.maximum(s2 * inv_n - mu * mu, 0.0)
        h3 = jnp.maximum((h3 - mu) * jax.lax.rsqrt(var + EPS) * g3 + be3, 0.0)

        # lane-dense store: mode m occupies lanes [m*n_agt, (m+1)*n_agt)
        out_ref[:, m * n_agt:(m + 1) * n_agt] = h3.astype(out_ref.dtype)


def att_dest(agts, agt_ctrs, dest_ctrs, params, *, block_agents=512):
    """agts: (N, n_agt), agt_ctrs: (N, 2), dest_ctrs: (N, num_mods, 2).
    Returns (N * num_mods, n_agt), matching the PyTorch forward."""
    N, n_agt = agts.shape
    num_mods = dest_ctrs.shape[1]

    w1t, vecs, w2t, w3at, w3bt = params

    # Fold the subtraction into one compact input:
    # row a = [dx_0, dy_0, dx_1, dy_1, ...]   (free reshape, tiny array)
    diff = (agt_ctrs[:, None, :] - dest_ctrs).reshape(N, num_mods * 2)
    diff = diff.astype(jnp.float32)

    # Agent tile (rows of the matmuls). Keep it a multiple of 8 sublanes and
    # pad N up so the grid divides evenly; padded rows are sliced off below.
    ta = max(8, (int(block_agents) // 8) * 8)
    if N <= ta:
        ta = max(8, -(-N // 8) * 8)
    N_pad = -(-N // ta) * ta
    if N_pad != N:
        pad = N_pad - N
        agts = jnp.pad(agts, ((0, pad), (0, 0)))
        diff = jnp.pad(diff, ((0, pad), (0, 0)))

    out = pl.pallas_call(
        attdest_kernel,
        out_shape=jax.ShapeDtypeStruct((N_pad, num_mods * n_agt), jnp.float32),
        grid=(N_pad // ta,),
        in_specs=[
            pl.BlockSpec((ta, num_mods * 2), lambda i: (i, 0)),   # diff
            pl.BlockSpec((ta, n_agt), lambda i: (i, 0)),          # agts (once)
            pl.BlockSpec((2, n_agt), lambda i: (0, 0)),           # W1.T
            pl.BlockSpec((8, n_agt), lambda i: (0, 0)),           # packed vecs
            pl.BlockSpec((n_agt, n_agt), lambda i: (0, 0)),       # W2.T
            pl.BlockSpec((n_agt, n_agt), lambda i: (0, 0)),       # W3a.T
            pl.BlockSpec((n_agt, n_agt), lambda i: (0, 0)),       # W3b.T
        ],
        out_specs=pl.BlockSpec((ta, num_mods * n_agt), lambda i: (i, 0)),
        compiler_params=pltpu.CompilerParams(
            dimension_semantics=("parallel",)),
    )(diff, agts, w1t, vecs, w2t, w3at, w3bt)

    # (N_pad, num_mods*n_agt) rows are already in (agent, mode) order:
    # reshape is free; drop the padded agents if any.
    out = out.reshape(N_pad * num_mods, n_agt)
    if N_pad != N:
        out = out[:N * num_mods]
    return out


def make_params(key, n_agt):
    ks = jax.random.split(key, 7)
    # nn.Linear(2, n_agt)      -> weight (n_agt, 2), bias (n_agt,)
    w1 = jax.random.normal(ks[0], (n_agt, 2), jnp.float32) / jnp.sqrt(2.0)
    b1 = jax.random.normal(ks[1], (n_agt,), jnp.float32) * 0.1
    # Linear(n_agt, n_agt, bias=False), GroupNorm(1, n_agt)
    w2 = jax.random.normal(ks[2], (n_agt, n_agt), jnp.float32) / jnp.sqrt(n_agt)
    g2 = 1.0 + 0.1 * jax.random.normal(ks[3], (n_agt,), jnp.float32)
    be2 = 0.05 * jax.random.normal(ks[4], (n_agt,), jnp.float32)
    # Linear(2*n_agt, n_agt, bias=False), GroupNorm(1, n_agt)
    w3 = jax.random.normal(ks[5], (n_agt, 2 * n_agt), jnp.float32) / jnp.sqrt(2.0 * n_agt)
    g3 = 1.0 + 0.1 * jax.random.normal(ks[6], (n_agt,), jnp.float32)
    be3 = jnp.zeros((n_agt,), jnp.float32)

    # pack the five per-channel vectors into one (8, n_agt) block
    vecs = jnp.zeros((8, n_agt), jnp.float32)
    vecs = vecs.at[0].set(b1).at[1].set(g2).at[2].set(be2).at[3].set(g3).at[4].set(be3)

    return (
        w1.T,                          # (2, n_agt)
        vecs,                          # (8, n_agt): [b1, g2, be2, g3, be3, 0, 0, 0]
        w2.T,                          # (n_agt, n_agt)
        w3[:, :n_agt].T,               # (n_agt, n_agt)  (acts on dist)
        w3[:, n_agt:].T,               # (n_agt, n_agt)  (acts on agts)
    )


def att_dest_ref(agts, agt_ctrs, dest_ctrs, params):
    """Pure-JAX reference replicating the PyTorch forward."""
    w1t, vecs, w2t, w3at, w3bt = params
    b1, g2, be2, g3, be3 = vecs[0], vecs[1], vecs[2], vecs[3], vecs[4]
    N, n_agt = agts.shape
    num_mods = dest_ctrs.shape[1]
    dist = (agt_ctrs[:, None, :] - dest_ctrs).reshape(-1, 2)
    h1 = jnp.maximum(dist @ w1t + b1, 0.0)
    h2 = h1 @ w2t
    mu = h2.mean(-1, keepdims=True)
    var = ((h2 - mu) ** 2).mean(-1, keepdims=True)
    h2 = jnp.maximum((h2 - mu) / jnp.sqrt(var + EPS) * g2 + be2, 0.0)
    agts_rep = jnp.broadcast_to(agts[:, None, :], (N, num_mods, n_agt)).reshape(-1, n_agt)
    h3 = h2 @ w3at + agts_rep @ w3bt
    mu3 = h3.mean(-1, keepdims=True)
    var3 = ((h3 - mu3) ** 2).mean(-1, keepdims=True)
    return jnp.maximum((h3 - mu3) / jnp.sqrt(var3 + EPS) * g3 + be3, 0.0)


if __name__ == "__main__":
    key = jax.random.PRNGKey(0)
    k_agt, k_ctr, k_dst, k_par = jax.random.split(key, 4)

    N, num_mods, n_agt = 20, 6, 32
    agts = jax.random.normal(k_agt, (N, n_agt), jnp.float32)
    agt_ctrs = jax.random.normal(k_ctr, (N, 2), jnp.float32)
    dest_ctrs = jax.random.normal(k_dst, (N, num_mods, 2), jnp.float32)

    params = make_params(k_par, n_agt)
    ref = att_dest_ref(agts, agt_ctrs, dest_ctrs, params)

    # small tile -> exercises the multi-block grid + agent padding path
    out = att_dest(agts, agt_ctrs, dest_ctrs, params, block_agents=8)
    out = jax.block_until_ready(out)
    assert out.shape == (N * num_mods, n_agt)
    assert jnp.allclose(out, ref, atol=2e-4, rtol=2e-4), "mismatch vs reference (small tile)"

    # default (large) tile -> single-block path
    out_big = att_dest(agts, agt_ctrs, dest_ctrs, params)
    out_big = jax.block_until_ready(out_big)
    assert jnp.allclose(out_big, ref, atol=2e-4, rtol=2e-4), "mismatch vs reference (big tile)"

    print("KERNEL_OK")
</pallas_src>

<mosaic_0001>
module attributes {stable_mosaic.version = 11 : i64} {
  func.func @attdest_kernel(%arg0: i32, %arg1: memref<8x12xf32, #tpu.memory_space<vmem>>, %arg2: memref<8x32xf32, #tpu.memory_space<vmem>>, %arg3: memref<2x32xf32, #tpu.memory_space<vmem>>, %arg4: memref<8x32xf32, #tpu.memory_space<vmem>>, %arg5: memref<32x32xf32, #tpu.memory_space<vmem>>, %arg6: memref<32x32xf32, #tpu.memory_space<vmem>>, %arg7: memref<32x32xf32, #tpu.memory_space<vmem>>, %arg8: memref<8x192xf32, #tpu.memory_space<vmem>>) attributes {dimension_semantics = [#tpu.dimension_semantics<parallel>], iteration_bounds = array<i64: 3>, scalar_prefetch = 0 : i64, scratch_operands = 0 : i64, tpu.core_type = #tpu.core_type<tc>, window_params = [{transform_indices = @transform_0, window_bounds = array<i64: 8, 12>}, {transform_indices = @transform_1, window_bounds = array<i64: 8, 32>}, {pipeline_mode = #tpu.pipeline_mode<synchronous>, transform_indices = @transform_2, window_bounds = array<i64: 2, 32>}, {pipeline_mode = #tpu.pipeline_mode<synchronous>, transform_indices = @transform_3, window_bounds = array<i64: 8, 32>}, {pipeline_mode = #tpu.pipeline_mode<synchronous>, transform_indices = @transform_4, window_bounds = array<i64: 32, 32>}, {pipeline_mode = #tpu.pipeline_mode<synchronous>, transform_indices = @transform_5, window_bounds = array<i64: 32, 32>}, {pipeline_mode = #tpu.pipeline_mode<synchronous>, transform_indices = @transform_6, window_bounds = array<i64: 32, 32>}, {transform_indices = @transform_7, window_bounds = array<i64: 8, 192>}]} {
    %c0 = arith.constant 0 : index
    %c0_0 = arith.constant 0 : index
    %0 = vector.load %arg4[%c0, %c0_0] : memref<8x32xf32, #tpu.memory_space<vmem>>, vector<1x32xf32>
    %c1 = arith.constant 1 : index
    %c0_1 = arith.constant 0 : index
    %1 = vector.load %arg4[%c1, %c0_1] : memref<8x32xf32, #tpu.memory_space<vmem>>, vector<1x32xf32>
    %c2 = arith.constant 2 : index
    %c0_2 = arith.constant 0 : index
    %2 = vector.load %arg4[%c2, %c0_2] : memref<8x32xf32, #tpu.memory_space<vmem>>, vector<1x32xf32>
    %c3 = arith.constant 3 : index
    %c0_3 = arith.constant 0 : index
    %3 = vector.load %arg4[%c3, %c0_3] : memref<8x32xf32, #tpu.memory_space<vmem>>, vector<1x32xf32>
    %c4 = arith.constant 4 : index
    %c0_4 = arith.constant 0 : index
    %4 = vector.load %arg4[%c4, %c0_4] : memref<8x32xf32, #tpu.memory_space<vmem>>, vector<1x32xf32>
    %c0_5 = arith.constant 0 : index
    %c0_6 = arith.constant 0 : index
    %5 = vector.load %arg3[%c0_5, %c0_6] : memref<2x32xf32, #tpu.memory_space<vmem>>, vector<1x32xf32>
    %c1_7 = arith.constant 1 : index
    %c0_8 = arith.constant 0 : index
    %6 = vector.load %arg3[%c1_7, %c0_8] : memref<2x32xf32, #tpu.memory_space<vmem>>, vector<1x32xf32>
    %c0_9 = arith.constant 0 : index
    %c0_10 = arith.constant 0 : index
    %7 = vector.load %arg5[%c0_9, %c0_10] : memref<32x32xf32, #tpu.memory_space<vmem>>, vector<32x32xf32>
    %c0_11 = arith.constant 0 : index
    %c0_12 = arith.constant 0 : index
    %8 = vector.load %arg6[%c0_11, %c0_12] : memref<32x32xf32, #tpu.memory_space<vmem>>, vector<32x32xf32>
    %c0_13 = arith.constant 0 : index
    %c0_14 = arith.constant 0 : index
    %9 = vector.load %arg2[%c0_13, %c0_14] : memref<8x32xf32, #tpu.memory_space<vmem>>, vector<8x32xf32>
    %c0_15 = arith.constant 0 : index
    %c0_16 = arith.constant 0 : index
    %10 = vector.load %arg7[%c0_15, %c0_16] : memref<32x32xf32, #tpu.memory_space<vmem>>, vector<32x32xf32>
    %cst = arith.constant dense<0.000000e+00> : vector<8x32xf32>
    %11 = tpu.matmul %9, %10, %cst {dimension_numbers = #tpu.dot_dimension_numbers<[1], [0], [0], [1], [0, 0, 1, 1], [], []>} : vector<8x32xf32>, vector<32x32xf32>, vector<8x32xf32> -> vector<8x32xf32>
    %c0_17 = arith.constant 0 : index
    %c0_18 = arith.constant 0 : index
    %12 = vector.load %arg1[%c0_17, %c0_18] : memref<8x12xf32, #tpu.memory_space<vmem>>, vector<8x1xf32>
    %c0_19 = arith.constant 0 : index
    %c1_20 = arith.constant 1 : index
    %13 = vector.load %arg1[%c0_19, %c1_20] : memref<8x12xf32, #tpu.memory_space<vmem>>, vector<8x1xf32>
    %14 = vector.broadcast %12 : vector<8x1xf32> to vector<8x32xf32>
    %15 = vector.broadcast %5 : vector<1x32xf32> to vector<8x32xf32>
    %16 = arith.mulf %14, %15 : vector<8x32xf32>
    %17 = vector.broadcast %13 : vector<8x1xf32> to vector<8x32xf32>
    %18 = vector.broadcast %6 : vector<1x32xf32> to vector<8x32xf32>
    %19 = arith.mulf %17, %18 : vector<8x32xf32>
    %20 = arith.addf %16, %19 : vector<8x32xf32>
    %21 = vector.broadcast %0 : vector<1x32xf32> to vector<8x32xf32>
    %22 = arith.addf %20, %21 : vector<8x32xf32>
    %cst_21 = arith.constant 0.000000e+00 : f32
    %23 = vector.broadcast %cst_21 : f32 to vector<8x32xf32>
    %24 = arith.maximumf %22, %23 : vector<8x32xf32>
    %cst_22 = arith.constant dense<0.000000e+00> : vector<8x32xf32>
    %25 = tpu.matmul %24, %7, %cst_22 {dimension_numbers = #tpu.dot_dimension_numbers<[1], [0], [0], [1], [0, 0, 1, 1], [], []>} : vector<8x32xf32>, vector<32x32xf32>, vector<8x32xf32> -> vector<8x32xf32>
    %cst_23 = arith.constant dense<0.000000e+00> : vector<8xf32>
    %26 = vector.multi_reduction <add>, %25, %cst_23 [1] : vector<8x32xf32> to vector<8xf32>
    %27 = vector.shape_cast %26 : vector<8xf32> to vector<8x1xf32>
    %28 = arith.mulf %25, %25 : vector<8x32xf32>
    %cst_24 = arith.constant dense<0.000000e+00> : vector<8xf32>
    %29 = vector.multi_reduction <add>, %28, %cst_24 [1] : vector<8x32xf32> to vector<8xf32>
    %30 = vector.shape_cast %29 : vector<8xf32> to vector<8x1xf32>
    %cst_25 = arith.constant 3.125000e-02 : f32
    %31 = vector.broadcast %cst_25 : f32 to vector<8x1xf32>
    %32 = arith.mulf %27, %31 : vector<8x1xf32>
    %cst_26 = arith.constant 3.125000e-02 : f32
    %33 = vector.broadcast %cst_26 : f32 to vector<8x1xf32>
    %34 = arith.mulf %30, %33 : vector<8x1xf32>
    %35 = arith.mulf %32, %32 : vector<8x1xf32>
    %36 = arith.subf %34, %35 : vector<8x1xf32>
    %cst_27 = arith.constant 0.000000e+00 : f32
    %37 = vector.broadcast %cst_27 : f32 to vector<8x1xf32>
    %38 = arith.maximumf %36, %37 : vector<8x1xf32>
    %39 = vector.broadcast %32 : vector<8x1xf32> to vector<8x32xf32>
    %40 = arith.subf %25, %39 : vector<8x32xf32>
    %cst_28 = arith.constant 9.99999974E-6 : f32
    %41 = vector.broadcast %cst_28 : f32 to vector<8x1xf32>
    %42 = arith.addf %38, %41 : vector<8x1xf32>
    %43 = math.rsqrt %42 : vector<8x1xf32>
    %44 = vector.broadcast %43 : vector<8x1xf32> to vector<8x32xf32>
    %45 = arith.mulf %40, %44 : vector<8x32xf32>
    %46 = vector.broadcast %1 : vector<1x32xf32> to vector<8x32xf32>
    %47 = arith.mulf %45, %46 : vector<8x32xf32>
    %48 = vector.broadcast %2 : vector<1x32xf32> to vector<8x32xf32>
    %49 = arith.addf %47, %48 : vector<8x32xf32>
    %cst_29 = arith.constant 0.000000e+00 : f32
    %50 = vector.broadcast %cst_29 : f32 to vector<8x32xf32>
    %51 = arith.maximumf %49, %50 : vector<8x32xf32>
    %cst_30 = arith.constant dense<0.000000e+00> : vector<8x32xf32>
    %52 = tpu.matmul %51, %8, %cst_30 {dimension_numbers = #tpu.dot_dimension_numbers<[1], [0], [0], [1], [0, 0, 1, 1], [], []>} : vector<8x32xf32>, vector<32x32xf32>, vector<8x32xf32> -> vector<8x32xf32>
    %53 = arith.addf %52, %11 : vector<8x32xf32>
    %cst_31 = arith.constant dense<0.000000e+00> : vector<8xf32>
    %54 = vector.multi_reduction <add>, %53, %cst_31 [1] : vector<8x32xf32> to vector<8xf32>
    %55 = vector.shape_cast %54 : vector<8xf32> to vector<8x1xf32>
    %56 = arith.mulf %53, %53 : vector<8x32xf32>
    %cst_32 = arith.constant dense<0.000000e+00> : vector<8xf32>
    %57 = vector.multi_reduction <add>, %56, %cst_32 [1] : vector<8x32xf32> to vector<8xf32>
    %58 = vector.shape_cast %57 : vector<8xf32> to vector<8x1xf32>
    %cst_33 = arith.constant 3.125000e-02 : f32
    %59 = vector.broadcast %cst_33 : f32 to vector<8x1xf32>
    %60 = arith.mulf %55, %59 : vector<8x1xf32>
    %cst_34 = arith.constant 3.125000e-02 : f32
    %61 = vector.broadcast %cst_34 : f32 to vector<8x1xf32>
    %62 = arith.mulf %58, %61 : vector<8x1xf32>
    %63 = arith.mulf %60, %60 : vector<8x1xf32>
    %64 = arith.subf %62, %63 : vector<8x1xf32>
    %cst_35 = arith.constant 0.000000e+00 : f32
    %65 = vector.broadcast %cst_35 : f32 to vector<8x1xf32>
    %66 = arith.maximumf %64, %65 : vector<8x1xf32>
    %67 = vector.broadcast %60 : vector<8x1xf32> to vector<8x32xf32>
    %68 = arith.subf %53, %67 : vector<8x32xf32>
    %cst_36 = arith.constant 9.99999974E-6 : f32
    %69 = vector.broadcast %cst_36 : f32 to vector<8x1xf32>
    %70 = arith.addf %66, %69 : vector<8x1xf32>
    %71 = math.rsqrt %70 : vector<8x1xf32>
    %72 = vector.broadcast %71 : vector<8x1xf32> to vector<8x32xf32>
    %73 = arith.mulf %68, %72 : vector<8x32xf32>
    %74 = vector.broadcast %3 : vector<1x32xf32> to vector<8x32xf32>
    %75 = arith.mulf %73, %74 : vector<8x32xf32>
    %76 = vector.broadcast %4 : vector<1x32xf32> to vector<8x32xf32>
    %77 = arith.addf %75, %76 : vector<8x32xf32>
    %cst_37 = arith.constant 0.000000e+00 : f32
    %78 = vector.broadcast %cst_37 : f32 to vector<8x32xf32>
    %79 = arith.maximumf %77, %78 : vector<8x32xf32>
    %c0_38 = arith.constant 0 : index
    %c0_39 = arith.constant 0 : index
    %80 = vector.load %arg8[%c0_38, %c0_39] : memref<8x192xf32, #tpu.memory_space<vmem>>, vector<8x32xf32>
    tpu.vector_store %arg8[%c0_38, %c0_39], %79 {strides = array<i32>} : memref<8x192xf32, #tpu.memory_space<vmem>>, vector<8x32xf32>,
    %c0_40 = arith.constant 0 : index
    %c2_41 = arith.constant 2 : index
    %81 = vector.load %arg1[%c0_40, %c2_41] : memref<8x12xf32, #tpu.memory_space<vmem>>, vector<8x1xf32>
    %c0_42 = arith.constant 0 : index
    %c3_43 = arith.constant 3 : index
    %82 = vector.load %arg1[%c0_42, %c3_43] : memref<8x12xf32, #tpu.memory_space<vmem>>, vector<8x1xf32>
    %83 = vector.broadcast %81 : vector<8x1xf32> to vector<8x32xf32>
    %84 = vector.broadcast %5 : vector<1x32xf32> to vector<8x32xf32>
    %85 = arith.mulf %83, %84 : vector<8x32xf32>
    %86 = vector.broadcast %82 : vector<8x1xf32> to vector<8x32xf32>
    %87 = vector.broadcast %6 : vector<1x32xf32> to vector<8x32xf32>
    %88 = arith.mulf %86, %87 : vector<8x32xf32>
    %89 = arith.addf %85, %88 : vector<8x32xf32>
    %90 = vector.broadcast %0 : vector<1x32xf32> to vector<8x32xf32>
    %91 = arith.addf %89, %90 : vector<8x32xf32>
    %cst_44 = arith.constant 0.000000e+00 : f32
    %92 = vector.broadcast %cst_44 : f32 to vector<8x32xf32>
    %93 = arith.maximumf %91, %92 : vector<8x32xf32>
    %cst_45 = arith.constant dense<0.000000e+00> : vector<8x32xf32>
    %94 = tpu.matmul %93, %7, %cst_45 {dimension_numbers = #tpu.dot_dimension_numbers<[1], [0], [0], [1], [0, 0, 1, 1], [], []>} : vector<8x32xf32>, vector<32x32xf32>, vector<8x32xf32> -> vector<8x32xf32>
    %cst_46 = arith.constant dense<0.000000e+00> : vector<8xf32>
    %95 = vector.multi_reduction <add>, %94, %cst_46 [1] : vector<8x32xf32> to vector<8xf32>
    %96 = vector.shape_cast %95 : vector<8xf32> to vector<8x1xf32>
    %97 = arith.mulf %94, %94 : vector<8x32xf32>
    %cst_47 = arith.constant dense<0.000000e+00> : vector<8xf32>
    %98 = vector.multi_reduction <add>, %97, %cst_47 [1] : vector<8x32xf32> to vector<8xf32>
    %99 = vector.shape_cast %98 : vector<8xf32> to vector<8x1xf32>
    %cst_48 = arith.constant 3.125000e-02 : f32
    %100 = vector.broadcast %cst_48 : f32 to vector<8x1xf32>
    %101 = arith.mulf %96, %100 : vector<8x1xf32>
    %cst_49 = arith.constant 3.125000e-02 : f32
    %102 = vector.broadcast %cst_49 : f32 to vector<8x1xf32>
    %103 = arith.mulf %99, %102 : vector<8x1xf32>
    %104 = arith.mulf %101, %101 : vector<8x1xf32>
    %105 = arith.subf %103, %104 : vector<8x1xf32>
    %cst_50 = arith.constant 0.000000e+00 : f32
    %106 = vector.broadcast %cst_50 : f32 to vector<8x1xf32>
    %107 = arith.maximumf %105, %106 : vector<8x1xf32>
    %108 = vector.broadcast %101 : vector<8x1xf32> to vector<8x32xf32>
    %109 = arith.subf %94, %108 : vector<8x32xf32>
    %cst_51 = arith.constant 9.99999974E-6 : f32
    %110 = vector.broadcast %cst_51 : f32 to vector<8x1xf32>
    %111 = arith.addf %107, %110 : vector<8x1xf32>
    %112 = math.rsqrt %111 : vector<8x1xf32>
    %113 = vector.broadcast %112 : vector<8x1xf32> to vector<8x32xf32>
    %114 = arith.mulf %109, %113 : vector<8x32xf32>
    %115 = vector.broadcast %1 : vector<1x32xf32> to vector<8x32xf32>
    %116 = arith.mulf %114, %115 : vector<8x32xf32>
    %117 = vector.broadcast %2 : vector<1x32xf32> to vector<8x32xf32>
    %118 = arith.addf %116, %117 : vector<8x32xf32>
    %cst_52 = arith.constant 0.000000e+00 : f32
    %119 = vector.broadcast %cst_52 : f32 to vector<8x32xf32>
    %120 = arith.maximumf %118, %119 : vector<8x32xf32>
    %cst_53 = arith.constant dense<0.000000e+00> : vector<8x32xf32>
    %121 = tpu.matmul %120, %8, %cst_53 {dimension_numbers = #tpu.dot_dimension_numbers<[1], [0], [0], [1], [0, 0, 1, 1], [], []>} : vector<8x32xf32>, vector<32x32xf32>, vector<8x32xf32> -> vector<8x32xf32>
    %122 = arith.addf %121, %11 : vector<8x32xf32>
    %cst_54 = arith.constant dense<0.000000e+00> : vector<8xf32>
    %123 = vector.multi_reduction <add>, %122, %cst_54 [1] : vector<8x32xf32> to vector<8xf32>
    %124 = vector.shape_cast %123 : vector<8xf32> to vector<8x1xf32>
    %125 = arith.mulf %122, %122 : vector<8x32xf32>
    %cst_55 = arith.constant dense<0.000000e+00> : vector<8xf32>
    %126 = vector.multi_reduction <add>, %125, %cst_55 [1] : vector<8x32xf32> to vector<8xf32>
    %127 = vector.shape_cast %126 : vector<8xf32> to vector<8x1xf32>
    %cst_56 = arith.constant 3.125000e-02 : f32
    %128 = vector.broadcast %cst_56 : f32 to vector<8x1xf32>
    %129 = arith.mulf %124, %128 : vector<8x1xf32>
    %cst_57 = arith.constant 3.125000e-02 : f32
    %130 = vector.broadcast %cst_57 : f32 to vector<8x1xf32>
    %131 = arith.mulf %127, %130 : vector<8x1xf32>
    %132 = arith.mulf %129, %129 : vector<8x1xf32>
    %133 = arith.subf %131, %132 : vector<8x1xf32>
    %cst_58 = arith.constant 0.000000e+00 : f32
    %134 = vector.broadcast %cst_58 : f32 to vector<8x1xf32>
    %135 = arith.maximumf %133, %134 : vector<8x1xf32>
    %136 = vector.broadcast %129 : vector<8x1xf32> to vector<8x32xf32>
    %137 = arith.subf %122, %136 : vector<8x32xf32>
    %cst_59 = arith.constant 9.99999974E-6 : f32
    %138 = vector.broadcast %cst_59 : f32 to vector<8x1xf32>
    %139 = arith.addf %135, %138 : vector<8x1xf32>
    %140 = math.rsqrt %139 : vector<8x1xf32>
    %141 = vector.broadcast %140 : vector<8x1xf32> to vector<8x32xf32>
    %142 = arith.mulf %137, %141 : vector<8x32xf32>
    %143 = vector.broadcast %3 : vector<1x32xf32> to vector<8x32xf32>
    %144 = arith.mulf %142, %143 : vector<8x32xf32>
    %145 = vector.broadcast %4 : vector<1x32xf32> to vector<8x32xf32>
    %146 = arith.addf %144, %145 : vector<8x32xf32>
    %cst_60 = arith.constant 0.000000e+00 : f32
    %147 = vector.broadcast %cst_60 : f32 to vector<8x32xf32>
    %148 = arith.maximumf %146, %147 : vector<8x32xf32>
    %c0_61 = arith.constant 0 : index
    %c32 = arith.constant 32 : index
    %149 = vector.load %arg8[%c0_61, %c32] : memref<8x192xf32, #tpu.memory_space<vmem>>, vector<8x32xf32>
    tpu.vector_store %arg8[%c0_61, %c32], %148 {strides = array<i32>} : memref<8x192xf32, #tpu.memory_space<vmem>>, vector<8x32xf32>,
    %c0_62 = arith.constant 0 : index
    %c4_63 = arith.constant 4 : index
    %150 = vector.load %arg1[%c0_62, %c4_63] : memref<8x12xf32, #tpu.memory_space<vmem>>, vector<8x1xf32>
    %c0_64 = arith.constant 0 : index
    %c5 = arith.constant 5 : index
    %151 = vector.load %arg1[%c0_64, %c5] : memref<8x12xf32, #tpu.memory_space<vmem>>, vector<8x1xf32>
    %152 = vector.broadcast %150 : vector<8x1xf32> to vector<8x32xf32>
    %153 = vector.broadcast %5 : vector<1x32xf32> to vector<8x32xf32>
    %154 = arith.mulf %152, %153 : vector<8x32xf32>
    %155 = vector.broadcast %151 : vector<8x1xf32> to vector<8x32xf32>
    %156 = vector.broadcast %6 : vector<1x32xf32> to vector<8x32xf32>
    %157 = arith.mulf %155, %156 : vector<8x32xf32>
    %158 = arith.addf %154, %157 : vector<8x32xf32>
    %159 = vector.broadcast %0 : vector<1x32xf32> to vector<8x32xf32>
    %160 = arith.addf %158, %159 : vector<8x32xf32>
    %cst_65 = arith.constant 0.000000e+00 : f32
    %161 = vector.broadcast %cst_65 : f32 to vector<8x32xf32>
    %162 = arith.maximumf %160, %161 : vector<8x32xf32>
    %cst_66 = arith.constant dense<0.000000e+00> : vector<8x32xf32>
    %163 = tpu.matmul %162, %7, %cst_66 {dimension_numbers = #tpu.dot_dimension_numbers<[1], [0], [0], [1], [0, 0, 1, 1], [], []>} : vector<8x32xf32>, vector<32x32xf32>, vector<8x32xf32> -> vector<8x32xf32>
    %cst_67 = arith.constant dense<0.000000e+00> : vector<8xf32>
    %164 = vector.multi_reduction <add>, %163, %cst_67 [1] : vector<8x32xf32> to vector<8xf32>
    %165 = vector.shape_cast %164 : vector<8xf32> to vector<8x1xf32>
    %166 = arith.mulf %163, %163 : vector<8x32xf32>
    %cst_68 = arith.constant dense<0.000000e+00> : vector<8xf32>
    %167 = vector.multi_reduction <add>, %166, %cst_68 [1] : vector<8x32xf32> to vector<8xf32>
    %168 = vector.shape_cast %167 : vector<8xf32> to vector<8x1xf32>
    %cst_69 = arith.constant 3.125000e-02 : f32
    %169 = vector.broadcast %cst_69 : f32 to vector<8x1xf32>
    %170 = arith.mulf %165, %169 : vector<8x1xf32>
    %cst_70 = arith.constant 3.125000e-02 : f32
    %171 = vector.broadcast %cst_70 : f32 to vector<8x1xf32>
    %172 = arith.mulf %168, %171 : vector<8x1xf32>
    %173 = arith.mulf %170, %170 : vector<8x1xf32>
    %174 = arith.subf %172, %173 : vector<8x1xf32>
    %cst_71 = arith.constant 0.000000e+00 : f32
    %175 = vector.broadcast %cst_71 : f32 to vector<8x1xf32>
    %176 = arith.maximumf %174, %175 : vector<8x1xf32>
    %177 = vector.broadcast %170 : vector<8x1xf32> to vector<8x32xf32>
    %178 = arith.subf %163, %177 : vector<8x32xf32>
    %cst_72 = arith.constant 9.99999974E-6 : f32
    %179 = vector.broadcast %cst_72 : f32 to vector<8x1xf32>
    %180 = arith.addf %176, %179 : vector<8x1xf32>
    %181 = math.rsqrt %180 : vector<8x1xf32>
    %182 = vector.broadcast %181 : vector<8x1xf32> to vector<8x32xf32>
    %183 = arith.mulf %178, %182 : vector<8x32xf32>
    %184 = vector.broadcast %1 : vector<1x32xf32> to vector<8x32xf32>
    %185 = arith.mulf %183, %184 : vector<8x32xf32>
    %186 = vector.broadcast %2 : vector<1x32xf32> to vector<8x32xf32>
    %187 = arith.addf %185, %186 : vector<8x32xf32>
    %cst_73 = arith.constant 0.000000e+00 : f32
    %188 = vector.broadcast %cst_73 : f32 to vector<8x32xf32>
    %189 = arith.maximumf %187, %188 : vector<8x32xf32>
    %cst_74 = arith.constant dense<0.000000e+00> : vector<8x32xf32>
    %190 = tpu.matmul %189, %8, %cst_74 {dimension_numbers = #tpu.dot_dimension_numbers<[1], [0], [0], [1], [0, 0, 1, 1], [], []>} : vector<8x32xf32>, vector<32x32xf32>, vector<8x32xf32> -> vector<8x32xf32>
    %191 = arith.addf %190, %11 : vector<8x32xf32>
    %cst_75 = arith.constant dense<0.000000e+00> : vector<8xf32>
    %192 = vector.multi_reduction <add>, %191, %cst_75 [1] : vector<8x32xf32> to vector<8xf32>
    %193 = vector.shape_cast %192 : vector<8xf32> to vector<8x1xf32>
    %194 = arith.mulf %191, %191 : vector<8x32xf32>
    %cst_76 = arith.constant dense<0.000000e+00> : vector<8xf32>
    %195 = vector.multi_reduction <add>, %194, %cst_76 [1] : vector<8x32xf32> to vector<8xf32>
    %196 = vector.shape_cast %195 : vector<8xf32> to vector<8x1xf32>
    %cst_77 = arith.constant 3.125000e-02 : f32
    %197 = vector.broadcast %cst_77 : f32 to vector<8x1xf32>
    %198 = arith.mulf %193, %197 : vector<8x1xf32>
    %cst_78 = arith.constant 3.125000e-02 : f32
    %199 = vector.broadcast %cst_78 : f32 to vector<8x1xf32>
    %200 = arith.mulf %196, %199 : vector<8x1xf32>
    %201 = arith.mulf %198, %198 : vector<8x1xf32>
    %202 = arith.subf %200, %201 : vector<8x1xf32>
    %cst_79 = arith.constant 0.000000e+00 : f32
    %203 = vector.broadcast %cst_79 : f32 to vector<8x1xf32>
    %204 = arith.maximumf %202, %203 : vector<8x1xf32>
    %205 = vector.broadcast %198 : vector<8x1xf32> to vector<8x32xf32>
    %206 = arith.subf %191, %205 : vector<8x32xf32>
    %cst_80 = arith.constant 9.99999974E-6 : f32
    %207 = vector.broadcast %cst_80 : f32 to vector<8x1xf32>
    %208 = arith.addf %204, %207 : vector<8x1xf32>
    %209 = math.rsqrt %208 : vector<8x1xf32>
    %210 = vector.broadcast %209 : vector<8x1xf32> to vector<8x32xf32>
    %211 = arith.mulf %206, %210 : vector<8x32xf32>
    %212 = vector.broadcast %3 : vector<1x32xf32> to vector<8x32xf32>
    %213 = arith.mulf %211, %212 : vector<8x32xf32>
    %214 = vector.broadcast %4 : vector<1x32xf32> to vector<8x32xf32>
    %215 = arith.addf %213, %214 : vector<8x32xf32>
    %cst_81 = arith.constant 0.000000e+00 : f32
    %216 = vector.broadcast %cst_81 : f32 to vector<8x32xf32>
    %217 = arith.maximumf %215, %216 : vector<8x32xf32>
    %c0_82 = arith.constant 0 : index
    %c64 = arith.constant 64 : index
    %218 = vector.load %arg8[%c0_82, %c64] : memref<8x192xf32, #tpu.memory_space<vmem>>, vector<8x32xf32>
    tpu.vector_store %arg8[%c0_82, %c64], %217 {strides = array<i32>} : memref<8x192xf32, #tpu.memory_space<vmem>>, vector<8x32xf32>,
    %c0_83 = arith.constant 0 : index
    %c6 = arith.constant 6 : index
    %219 = vector.load %arg1[%c0_83, %c6] : memref<8x12xf32, #tpu.memory_space<vmem>>, vector<8x1xf32>
    %c0_84 = arith.constant 0 : index
    %c7 = arith.constant 7 : index
    %220 = vector.load %arg1[%c0_84, %c7] : memref<8x12xf32, #tpu.memory_space<vmem>>, vector<8x1xf32>
    %221 = vector.broadcast %219 : vector<8x1xf32> to vector<8x32xf32>
    %222 = vector.broadcast %5 : vector<1x32xf32> to vector<8x32xf32>
    %223 = arith.mulf %221, %222 : vector<8x32xf32>
    %224 = vector.broadcast %220 : vector<8x1xf32> to vector<8x32xf32>
    %225 = vector.broadcast %6 : vector<1x32xf32> to vector<8x32xf32>
    %226 = arith.mulf %224, %225 : vector<8x32xf32>
    %227 = arith.addf %223, %226 : vector<8x32xf32>
    %228 = vector.broadcast %0 : vector<1x32xf32> to vector<8x32xf32>
    %229 = arith.addf %227, %228 : vector<8x32xf32>
    %cst_85 = arith.constant 0.000000e+00 : f32
    %230 = vector.broadcast %cst_85 : f32 to vector<8x32xf32>
    %231 = arith.maximumf %229, %230 : vector<8x32xf32>
    %cst_86 = arith.constant dense<0.000000e+00> : vector<8x32xf32>
    %232 = tpu.matmul %231, %7, %cst_86 {dimension_numbers = #tpu.dot_dimension_numbers<[1], [0], [0], [1], [0, 0, 1, 1], [], []>} : vector<8x32xf32>, vector<32x32xf32>, vector<8x32xf32> -> vector<8x32xf32>
    %cst_87 = arith.constant dense<0.000000e+00> : vector<8xf32>
    %233 = vector.multi_reduction <add>, %232, %cst_87 [1] : vector<8x32xf32> to vector<8xf32>
    %234 = vector.shape_cast %233 : vector<8xf32> to vector<8x1xf32>
    %235 = arith.mulf %232, %232 : vector<8x32xf32>
    %cst_88 = arith.constant dense<0.000000e+00> : vector<8xf32>
    %236 = vector.multi_reduction <add>, %235, %cst_88 [1] : vector<8x32xf32> to vector<8xf32>
    %237 = vector.shape_cast %236 : vector<8xf32> to vector<8x1xf32>
    %cst_89 = arith.constant 3.125000e-02 : f32
    %238 = vector.broadcast %cst_89 : f32 to vector<8x1xf32>
    %239 = arith.mulf %234, %238 : vector<8x1xf32>
    %cst_90 = arith.constant 3.125000e-02 : f32
    %240 = vector.broadcast %cst_90 : f32 to vector<8x1xf32>
    %241 = arith.mulf %237, %240 : vector<8x1xf32>
    %242 = arith.mulf %239, %239 : vector<8x1xf32>
    %243 = arith.subf %241, %242 : vector<8x1xf32>
    %cst_91 = arith.constant 0.000000e+00 : f32
    %244 = vector.broadcast %cst_91 : f32 to vector<8x1xf32>
    %245 = arith.maximumf %243, %244 : vector<8x1xf32>
    %246 = vector.broadcast %239 : vector<8x1xf32> to vector<8x32xf32>
    %247 = arith.subf %232, %246 : vector<8x32xf32>
    %cst_92 = arith.constant 9.99999974E-6 : f32
    %248 = vector.broadcast %cst_92 : f32 to vector<8x1xf32>
    %249 = arith.addf %245, %248 : vector<8x1xf32>
    %250 = math.rsqrt %249 : vector<8x1xf32>
    %251 = vector.broadcast %250 : vector<8x1xf32> to vector<8x32xf32>
    %252 = arith.mulf %247, %251 : vector<8x32xf32>
    %253 = vector.broadcast %1 : vector<1x32xf32> to vector<8x32xf32>
    %254 = arith.mulf %252, %253 : vector<8x32xf32>
    %255 = vector.broadcast %2 : vector<1x32xf32> to vector<8x32xf32>
    %256 = arith.addf %254, %255 : vector<8x32xf32>
    %cst_93 = arith.constant 0.000000e+00 : f32
    %257 = vector.broadcast %cst_93 : f32 to vector<8x32xf32>
    %258 = arith.maximumf %256, %257 : vector<8x32xf32>
    %cst_94 = arith.constant dense<0.000000e+00> : vector<8x32xf32>
    %259 = tpu.matmul %258, %8, %cst_94 {dimension_numbers = #tpu.dot_dimension_numbers<[1], [0], [0], [1], [0, 0, 1, 1], [], []>} : vector<8x32xf32>, vector<32x32xf32>, vector<8x32xf32> -> vector<8x32xf32>
    %260 = arith.addf %259, %11 : vector<8x32xf32>
    %cst_95 = arith.constant dense<0.000000e+00> : vector<8xf32>
    %261 = vector.multi_reduction <add>, %260, %cst_95 [1] : vector<8x32xf32> to vector<8xf32>
    %262 = vector.shape_cast %261 : vector<8xf32> to vector<8x1xf32>
    %263 = arith.mulf %260, %260 : vector<8x32xf32>
    %cst_96 = arith.constant dense<0.000000e+00> : vector<8xf32>
    %264 = vector.multi_reduction <add>, %263, %cst_96 [1] : vector<8x32xf32> to vector<8xf32>
    %265 = vector.shape_cast %264 : vector<8xf32> to vector<8x1xf32>
    %cst_97 = arith.constant 3.125000e-02 : f32
    %266 = vector.broadcast %cst_97 : f32 to vector<8x1xf32>
    %267 = arith.mulf %262, %266 : vector<8x1xf32>
    %cst_98 = arith.constant 3.125000e-02 : f32
    %268 = vector.broadcast %cst_98 : f32 to vector<8x1xf32>
    %269 = arith.mulf %265, %268 : vector<8x1xf32>
    %270 = arith.mulf %267, %267 : vector<8x1xf32>
    %271 = arith.subf %269, %270 : vector<8x1xf32>
    %cst_99 = arith.constant 0.000000e+00 : f32
    %272 = vector.broadcast %cst_99 : f32 to vector<8x1xf32>
    %273 = arith.maximumf %271, %272 : vector<8x1xf32>
    %274 = vector.broadcast %267 : vector<8x1xf32> to vector<8x32xf32>
    %275 = arith.subf %260, %274 : vector<8x32xf32>
    %cst_100 = arith.constant 9.99999974E-6 : f32
    %276 = vector.broadcast %cst_100 : f32 to vector<8x1xf32>
    %277 = arith.addf %273, %276 : vector<8x1xf32>
    %278 = math.rsqrt %277 : vector<8x1xf32>
    %279 = vector.broadcast %278 : vector<8x1xf32> to vector<8x32xf32>
    %280 = arith.mulf %275, %279 : vector<8x32xf32>
    %281 = vector.broadcast %3 : vector<1x32xf32> to vector<8x32xf32>
    %282 = arith.mulf %280, %281 : vector<8x32xf32>
    %283 = vector.broadcast %4 : vector<1x32xf32> to vector<8x32xf32>
    %284 = arith.addf %282, %283 : vector<8x32xf32>
    %cst_101 = arith.constant 0.000000e+00 : f32
    %285 = vector.broadcast %cst_101 : f32 to vector<8x32xf32>
    %286 = arith.maximumf %284, %285 : vector<8x32xf32>
    %c0_102 = arith.constant 0 : index
    %c96 = arith.constant 96 : index
    %287 = vector.load %arg8[%c0_102, %c96] : memref<8x192xf32, #tpu.memory_space<vmem>>, vector<8x32xf32>
    tpu.vector_store %arg8[%c0_102, %c96], %286 {strides = array<i32>} : memref<8x192xf32, #tpu.memory_space<vmem>>, vector<8x32xf32>,
    %c0_103 = arith.constant 0 : index
    %c8 = arith.constant 8 : index
    %288 = vector.load %arg1[%c0_103, %c8] : memref<8x12xf32, #tpu.memory_space<vmem>>, vector<8x1xf32>
    %c0_104 = arith.constant 0 : index
    %c9 = arith.constant 9 : index
    %289 = vector.load %arg1[%c0_104, %c9] : memref<8x12xf32, #tpu.memory_space<vmem>>, vector<8x1xf32>
    %290 = vector.broadcast %288 : vector<8x1xf32> to vector<8x32xf32>
    %291 = vector.broadcast %5 : vector<1x32xf32> to vector<8x32xf32>
    %292 = arith.mulf %290, %291 : vector<8x32xf32>
    %293 = vector.broadcast %289 : vector<8x1xf32> to vector<8x32xf32>
    %294 = vector.broadcast %6 : vector<1x32xf32> to vector<8x32xf32>
    %295 = arith.mulf %293, %294 : vector<8x32xf32>
    %296 = arith.addf %292, %295 : vector<8x32xf32>
    %297 = vector.broadcast %0 : vector<1x32xf32> to vector<8x32xf32>
    %298 = arith.addf %296, %297 : vector<8x32xf32>
    %cst_105 = arith.constant 0.000000e+00 : f32
    %299 = vector.broadcast %cst_105 : f32 to vector<8x32xf32>
    %300 = arith.maximumf %298, %299 : vector<8x32xf32>
    %cst_106 = arith.constant dense<0.000000e+00> : vector<8x32xf32>
    %301 = tpu.matmul %300, %7, %cst_106 {dimension_numbers = #tpu.dot_dimension_numbers<[1], [0], [0], [1], [0, 0, 1, 1], [], []>} : vector<8x32xf32>, vector<32x32xf32>, vector<8x32xf32> -> vector<8x32xf32>
    %cst_107 = arith.constant dense<0.000000e+00> : vector<8xf32>
    %302 = vector.multi_reduction <add>, %301, %cst_107 [1] : vector<8x32xf32> to vector<8xf32>
    %303 = vector.shape_cast %302 : vector<8xf32> to vector<8x1xf32>
    %304 = arith.mulf %301, %301 : vector<8x32xf32>
    %cst_108 = arith.constant dense<0.000000e+00> : vector<8xf32>
    %305 = vector.multi_reduction <add>, %304, %cst_108 [1] : vector<8x32xf32> to vector<8xf32>
    %306 = vector.shape_cast %305 : vector<8xf32> to vector<8x1xf32>
    %cst_109 = arith.constant 3.125000e-02 : f32
    %307 = vector.broadcast %cst_109 : f32 to vector<8x1xf32>
    %308 = arith.mulf %303, %307 : vector<8x1xf32>
    %cst_110 = arith.constant 3.125000e-02 : f32
    %309 = vector.broadcast %cst_110 : f32 to vector<8x1xf32>
    %310 = arith.mulf %306, %309 : vector<8x1xf32>
    %311 = arith.mulf %308, %308 : vector<8x1xf32>
    %312 = arith.subf %310, %311 : vector<8x1xf32>
    %cst_111 = arith.constant 0.000000e+00 : f32
    %313 = vector.broadcast %cst_111 : f32 to vector<8x1xf32>
    %314 = arith.maximumf %312, %313 : vector<8x1xf32>
    %315 = vector.broadcast %308 : vector<8x1xf32> to vector<8x32xf32>
    %316 = arith.subf %301, %315 : vector<8x32xf32>
    %cst_112 = arith.constant 9.99999974E-6 : f32
    %317 = vector.broadcast %cst_112 : f32 to vector<8x1xf32>
    %318 = arith.addf %314, %317 : vector<8x1xf32>
    %319 = math.rsqrt %318 : vector<8x1xf32>
    %320 = vector.broadcast %319 : vector<8x1xf32> to vector<8x32xf32>
    %321 = arith.mulf %316, %320 : vector<8x32xf32>
    %322 = vector.broadcast %1 : vector<1x32xf32> to vector<8x32xf32>
    %323 = arith.mulf %321, %322 : vector<8x32xf32>
    %324 = vector.broadcast %2 : vector<1x32xf32> to vector<8x32xf32>
    %325 = arith.addf %323, %324 : vector<8x32xf32>
    %cst_113 = arith.constant 0.000000e+00 : f32
    %326 = vector.broadcast %cst_113 : f32 to vector<8x32xf32>
    %327 = arith.maximumf %325, %326 : vector<8x32xf32>
    %cst_114 = arith.constant dense<0.000000e+00> : vector<8x32xf32>
    %328 = tpu.matmul %327, %8, %cst_114 {dimension_numbers = #tpu.dot_dimension_numbers<[1], [0], [0], [1], [0, 0, 1, 1], [], []>} : vector<8x32xf32>, vector<32x32xf32>, vector<8x32xf32> -> vector<8x32xf32>
    %329 = arith.addf %328, %11 : vector<8x32xf32>
    %cst_115 = arith.constant dense<0.000000e+00> : vector<8xf32>
    %330 = vector.multi_reduction <add>, %329, %cst_115 [1] : vector<8x32xf32> to vector<8xf32>
    %331 = vector.shape_cast %330 : vector<8xf32> to vector<8x1xf32>
    %332 = arith.mulf %329, %329 : vector<8x32xf32>
    %cst_116 = arith.constant dense<0.000000e+00> : vector<8xf32>
    %333 = vector.multi_reduction <add>, %332, %cst_116 [1] : vector<8x32xf32> to vector<8xf32>
    %334 = vector.shape_cast %333 : vector<8xf32> to vector<8x1xf32>
    %cst_117 = arith.constant 3.125000e-02 : f32
    %335 = vector.broadcast %cst_117 : f32 to vector<8x1xf32>
    %336 = arith.mulf %331, %335 : vector<8x1xf32>
    %cst_118 = arith.constant 3.125000e-02 : f32
    %337 = vector.broadcast %cst_118 : f32 to vector<8x1xf32>
    %338 = arith.mulf %334, %337 : vector<8x1xf32>
    %339 = arith.mulf %336, %336 : vector<8x1xf32>
    %340 = arith.subf %338, %339 : vector<8x1xf32>
    %cst_119 = arith.constant 0.000000e+00 : f32
    %341 = vector.broadcast %cst_119 : f32 to vector<8x1xf32>
    %342 = arith.maximumf %340, %341 : vector<8x1xf32>
    %343 = vector.broadcast %336 : vector<8x1xf32> to vector<8x32xf32>
    %344 = arith.subf %329, %343 : vector<8x32xf32>
    %cst_120 = arith.constant 9.99999974E-6 : f32
    %345 = vector.broadcast %cst_120 : f32 to vector<8x1xf32>
    %346 = arith.addf %342, %345 : vector<8x1xf32>
    %347 = math.rsqrt %346 : vector<8x1xf32>
    %348 = vector.broadcast %347 : vector<8x1xf32> to vector<8x32xf32>
    %349 = arith.mulf %344, %348 : vector<8x32xf32>
    %350 = vector.broadcast %3 : vector<1x32xf32> to vector<8x32xf32>
    %351 = arith.mulf %349, %350 : vector<8x32xf32>
    %352 = vector.broadcast %4 : vector<1x32xf32> to vector<8x32xf32>
    %353 = arith.addf %351, %352 : vector<8x32xf32>
    %cst_121 = arith.constant 0.000000e+00 : f32
    %354 = vector.broadcast %cst_121 : f32 to vector<8x32xf32>
    %355 = arith.maximumf %353, %354 : vector<8x32xf32>
    %c0_122 = arith.constant 0 : index
    %c128 = arith.constant 128 : index
    %356 = vector.load %arg8[%c0_122, %c128] : memref<8x192xf32, #tpu.memory_space<vmem>>, vector<8x32xf32>
    tpu.vector_store %arg8[%c0_122, %c128], %355 {strides = array<i32>} : memref<8x192xf32, #tpu.memory_space<vmem>>, vector<8x32xf32>,
    %c0_123 = arith.constant 0 : index
    %c10 = arith.constant 10 : index
    %357 = vector.load %arg1[%c0_123, %c10] : memref<8x12xf32, #tpu.memory_space<vmem>>, vector<8x1xf32>
    %c0_124 = arith.constant 0 : index
    %c11 = arith.constant 11 : index
    %358 = vector.load %arg1[%c0_124, %c11] : memref<8x12xf32, #tpu.memory_space<vmem>>, vector<8x1xf32>
    %359 = vector.broadcast %357 : vector<8x1xf32> to vector<8x32xf32>
    %360 = vector.broadcast %5 : vector<1x32xf32> to vector<8x32xf32>
    %361 = arith.mulf %359, %360 : vector<8x32xf32>
    %362 = vector.broadcast %358 : vector<8x1xf32> to vector<8x32xf32>
    %363 = vector.broadcast %6 : vector<1x32xf32> to vector<8x32xf32>
    %364 = arith.mulf %362, %363 : vector<8x32xf32>
    %365 = arith.addf %361, %364 : vector<8x32xf32>
    %366 = vector.broadcast %0 : vector<1x32xf32> to vector<8x32xf32>
    %367 = arith.addf %365, %366 : vector<8x32xf32>
    %cst_125 = arith.constant 0.000000e+00 : f32
    %368 = vector.broadcast %cst_125 : f32 to vector<8x32xf32>
    %369 = arith.maximumf %367, %368 : vector<8x32xf32>
    %cst_126 = arith.constant dense<0.000000e+00> : vector<8x32xf32>
    %370 = tpu.matmul %369, %7, %cst_126 {dimension_numbers = #tpu.dot_dimension_numbers<[1], [0], [0], [1], [0, 0, 1, 1], [], []>} : vector<8x32xf32>, vector<32x32xf32>, vector<8x32xf32> -> vector<8x32xf32>
    %cst_127 = arith.constant dense<0.000000e+00> : vector<8xf32>
    %371 = vector.multi_reduction <add>, %370, %cst_127 [1] : vector<8x32xf32> to vector<8xf32>
    %372 = vector.shape_cast %371 : vector<8xf32> to vector<8x1xf32>
    %373 = arith.mulf %370, %370 : vector<8x32xf32>
    %cst_128 = arith.constant dense<0.000000e+00> : vector<8xf32>
    %374 = vector.multi_reduction <add>, %373, %cst_128 [1] : vector<8x32xf32> to vector<8xf32>
    %375 = vector.shape_cast %374 : vector<8xf32> to vector<8x1xf32>
    %cst_129 = arith.constant 3.125000e-02 : f32
    %376 = vector.broadcast %cst_129 : f32 to vector<8x1xf32>
    %377 = arith.mulf %372, %376 : vector<8x1xf32>
    %cst_130 = arith.constant 3.125000e-02 : f32
    %378 = vector.broadcast %cst_130 : f32 to vector<8x1xf32>
    %379 = arith.mulf %375, %378 : vector<8x1xf32>
    %380 = arith.mulf %377, %377 : vector<8x1xf32>
    %381 = arith.subf %379, %380 : vector<8x1xf32>
    %cst_131 = arith.constant 0.000000e+00 : f32
    %382 = vector.broadcast %cst_131 : f32 to vector<8x1xf32>
    %383 = arith.maximumf %381, %382 : vector<8x1xf32>
    %384 = vector.broadcast %377 : vector<8x1xf32> to vector<8x32xf32>
    %385 = arith.subf %370, %384 : vector<8x32xf32>
    %cst_132 = arith.constant 9.99999974E-6 : f32
    %386 = vector.broadcast %cst_132 : f32 to vector<8x1xf32>
    %387 = arith.addf %383, %386 : vector<8x1xf32>
    %388 = math.rsqrt %387 : vector<8x1xf32>
    %389 = vector.broadcast %388 : vector<8x1xf32> to vector<8x32xf32>
    %390 = arith.mulf %385, %389 : vector<8x32xf32>
    %391 = vector.broadcast %1 : vector<1x32xf32> to vector<8x32xf32>
    %392 = arith.mulf %390, %391 : vector<8x32xf32>
    %393 = vector.broadcast %2 : vector<1x32xf32> to vector<8x32xf32>
    %394 = arith.addf %392, %393 : vector<8x32xf32>
    %cst_133 = arith.constant 0.000000e+00 : f32
    %395 = vector.broadcast %cst_133 : f32 to vector<8x32xf32>
    %396 = arith.maximumf %394, %395 : vector<8x32xf32>
    %cst_134 = arith.constant dense<0.000000e+00> : vector<8x32xf32>
    %397 = tpu.matmul %396, %8, %cst_134 {dimension_numbers = #tpu.dot_dimension_numbers<[1], [0], [0], [1], [0, 0, 1, 1], [], []>} : vector<8x32xf32>, vector<32x32xf32>, vector<8x32xf32> -> vector<8x32xf32>
    %398 = arith.addf %397, %11 : vector<8x32xf32>
    %cst_135 = arith.constant dense<0.000000e+00> : vector<8xf32>
    %399 = vector.multi_reduction <add>, %398, %cst_135 [1] : vector<8x32xf32> to vector<8xf32>
    %400 = vector.shape_cast %399 : vector<8xf32> to vector<8x1xf32>
    %401 = arith.mulf %398, %398 : vector<8x32xf32>
    %cst_136 = arith.constant dense<0.000000e+00> : vector<8xf32>
    %402 = vector.multi_reduction <add>, %401, %cst_136 [1] : vector<8x32xf32> to vector<8xf32>
    %403 = vector.shape_cast %402 : vector<8xf32> to vector<8x1xf32>
    %cst_137 = arith.constant 3.125000e-02 : f32
    %404 = vector.broadcast %cst_137 : f32 to vector<8x1xf32>
    %405 = arith.mulf %400, %404 : vector<8x1xf32>
    %cst_138 = arith.constant 3.125000e-02 : f32
    %406 = vector.broadcast %cst_138 : f32 to vector<8x1xf32>
    %407 = arith.mulf %403, %406 : vector<8x1xf32>
    %408 = arith.mulf %405, %405 : vector<8x1xf32>
    %409 = arith.subf %407, %408 : vector<8x1xf32>
    %cst_139 = arith.constant 0.000000e+00 : f32
    %410 = vector.broadcast %cst_139 : f32 to vector<8x1xf32>
    %411 = arith.maximumf %409, %410 : vector<8x1xf32>
    %412 = vector.broadcast %405 : vector<8x1xf32> to vector<8x32xf32>
    %413 = arith.subf %398, %412 : vector<8x32xf32>
    %cst_140 = arith.constant 9.99999974E-6 : f32
    %414 = vector.broadcast %cst_140 : f32 to vector<8x1xf32>
    %415 = arith.addf %411, %414 : vector<8x1xf32>
    %416 = math.rsqrt %415 : vector<8x1xf32>
    %417 = vector.broadcast %416 : vector<8x1xf32> to vector<8x32xf32>
    %418 = arith.mulf %413, %417 : vector<8x32xf32>
    %419 = vector.broadcast %3 : vector<1x32xf32> to vector<8x32xf32>
    %420 = arith.mulf %418, %419 : vector<8x32xf32>
    %421 = vector.broadcast %4 : vector<1x32xf32> to vector<8x32xf32>
    %422 = arith.addf %420, %421 : vector<8x32xf32>
    %cst_141 = arith.constant 0.000000e+00 : f32
    %423 = vector.broadcast %cst_141 : f32 to vector<8x32xf32>
    %424 = arith.maximumf %422, %423 : vector<8x32xf32>
    %c0_142 = arith.constant 0 : index
    %c160 = arith.constant 160 : index
    %425 = vector.load %arg8[%c0_142, %c160] : memref<8x192xf32, #tpu.memory_space<vmem>>, vector<8x32xf32>
    tpu.vector_store %arg8[%c0_142, %c160], %424 {strides = array<i32>} : memref<8x192xf32, #tpu.memory_space<vmem>>, vector<8x32xf32>,
    return
  }
  func.func @transform_0(%arg0: i32) -> (i32, i32) {
    %c0_i32 = arith.constant 0 : i32
    %c0_i32_0 = arith.constant 0 : i32
    return %arg0, %c0_i32 : i32, i32
  }
  func.func @transform_1(%arg0: i32) -> (i32, i32) {
    %c0_i32 = arith.constant 0 : i32
    %c0_i32_0 = arith.constant 0 : i32
    return %arg0, %c0_i32 : i32, i32
  }
  func.func @transform_2(%arg0: i32) -> (i32, i32) {
    %c0_i32 = arith.constant 0 : i32
    %c0_i32_0 = arith.constant 0 : i32
    %c0_i32_1 = arith.constant 0 : i32
    return %c0_i32, %c0_i32_0 : i32, i32
  }
  func.func @transform_3(%arg0: i32) -> (i32, i32) {
    %c0_i32 = arith.constant 0 : i32
    %c0_i32_0 = arith.constant 0 : i32
    %c0_i32_1 = arith.constant 0 : i32
    return %c0_i32, %c0_i32_0 : i32, i32
  }
  func.func @transform_4(%arg0: i32) -> (i32, i32) {
    %c0_i32 = arith.constant 0 : i32
    %c0_i32_0 = arith.constant 0 : i32
    %c0_i32_1 = arith.constant 0 : i32
    return %c0_i32, %c0_i32_0 : i32, i32
  }
  func.func @transform_5(%arg0: i32) -> (i32, i32) {
    %c0_i32 = arith.constant 0 : i32
    %c0_i32_0 = arith.constant 0 : i32
    %c0_i32_1 = arith.constant 0 : i32
    return %c0_i32, %c0_i32_0 : i32, i32
  }
  func.func @transform_6(%arg0: i32) -> (i32, i32) {
    %c0_i32 = arith.constant 0 : i32
    %c0_i32_0 = arith.constant 0 : i32
    %c0_i32_1 = arith.constant 0 : i32
    return %c0_i32, %c0_i32_0 : i32, i32
  }
  func.func @transform_7(%arg0: i32) -> (i32, i32) {
    %c0_i32 = arith.constant 0 : i32
    %c0_i32_0 = arith.constant 0 : i32
    return %arg0, %c0_i32 : i32, i32
  }
}

</mosaic_0001>

<bundles_post_ra>
// kernel: tpu_custom_call.1
= control target key start
LH: loop header
LB: loop body
LE: loop exit
PB: predicated region body
PF: predicated region fallthrough
CT: control target
= control target key end

     0   :  { %s2042_s0 = inlined_call_operand.vmem [shape: f32[24,12], index: 0, kind: input, shape index: {}]   ;;  %s2043_s1 = inlined_call_operand.hbm [shape: f32[24,32], index: 1, kind: input, shape index: {}]   ;;  %s2044_s2 = inlined_call_operand.vmem [shape: f32[2,32], index: 2, kind: input, shape index: {}]   ;;  %s2045_s3 = inlined_call_operand.vmem [shape: f32[8,32], index: 3, kind: input, shape index: {}]   ;;  %s2046_s4 = inlined_call_operand.vmem [shape: f32[32,32], index: 4, kind: input, shape index: {}]   ;;  %s2047_s5 = inlined_call_operand.hbm [shape: f32[32,32], index: 5, kind: input, shape index: {}]   ;;  %s2048_s6 = inlined_call_operand.hbm [shape: f32[32,32], index: 6, kind: input, shape index: {}]   ;;  %s2049_s7 = inlined_call_operand.hbm [shape: f32[24,192], index: 7, kind: output, shape index: {}]  }
   0x1   :  { %2050 = sst [smem:[#allocation12_spill]] %s2047_s5 }
   0x2   :  { %2051 = sst [smem:[#allocation13_spill]] %s2048_s6 }
   0x3   :  { %12 = vsyncpa [#allocation3], 0 }
   0x4   :  { %14 = vsyncpa [#allocation3 + $0x1], 0 }
   0x5   :  { %15 = vsyncpa [#allocation6], 0 }
   0x6   :  { %16 = vsyncpa [#allocation4], 0 }
   0x7   :  { %18 = vsyncpa [#allocation4 + $0x1], 0  ;;  %s1623_s24 = smov 0   ;;  %s1625_s25 = smov 0  }
   0x8   :  { %s1627_s26 = smov 0   ;;  %s1629_s27 = smov 0  }
   0x9 LB: > { %s2052_s5 = sld [smem:[#allocation12_spill]]  ;;  %s1647_s8 = sadd.s32 4294967295, %s1562_s27   ;;  %s1562_s27 = sphi %s1629_s27, %s2065_s27   ;;  %s1558_s26 = sphi %s1627_s26, %s2064_s26   ;;  %s1554_s25 = sphi %s1625_s25, %s2063_s25   ;;  %s1550_s24 = sphi %s1623_s24, %s2062_s24  }
   0xa   : > { %p1243_p0 = scmp.ge.s32.totalorder %s1562_s27, 1  ;;  %p71_p1 = scmp.eq.s32.totalorder %s1647_s8, 0 }
   0xb   : > { %p212_p2 = scmp.lt.s32.totalorder %s1562_s27, 4  ;;  %s1564_s10 = smov [#allocation5]  }
   0xc   : > { %s234_s11 = sshll.u32 %s1564_s10, 4  ;;  %s2054_s6 = sld [smem:[#allocation13_spill]]  ;;  %s235_s11 = int_to_ptr.vmem [resolvable:$true] %s234_s11 }
   0xd   : > { %p1652_p3 = pnand %p1243_p0, %p212_p2  ;;  %s1565_s15 = smov [#allocation7]  }
   0xe   : > { %s248_s16 = sshll.u32 %s1565_s15, 4  ;;  %s1566_s17 = smov 128   ;;  %s249_s16 = int_to_ptr.vmem [resolvable:$true] %s248_s16 }
   0xf   : > { %s232_s30 = sshll.u32 %s2052_s5, 4  ;;  %p1286_p4 = pneg %p1652_p3  ;;  %s233_s30 = int_to_ptr.hbm [resolvable:$true] %s232_s30 }
  0x10   : > { %s1567_s18 = smov 8   ;;  %s1242_s19 = sadd.s32 4294967294, %s1562_s27  }
  0x11   : > { %p1287_p5 = pnand %p1286_p4, %p71_p1  ;;  %s1665_s20 = sadd.s32 1, %s1562_s27  }
  0x12   : > { %s246_s14 = sshll.u32 %s2054_s6, 4  ;;  %s54_s21 = ssub.s32 %s1562_s27, %s1665_s20  ;;  %s247_s14 = int_to_ptr.hbm [resolvable:$true] %s246_s14 }
  0x13   : > { %1289 = dma.hbm_to_vmem [thread:$0]  (!%p1287_p5), %s233_s30, 512, %s235_s11, [#allocation6], %s1566_s17, %s1566_s17, %s1567_s18  }
  0x14   : > { %1292 = dma.hbm_to_vmem [thread:$0]  (!%p1287_p5), %s247_s14, 512, %s249_s16, [#allocation6], %s1566_s17, %s1566_s17, %s1567_s18  }
  0x15   : > { %s57_s22 = sadd.s32 1, %s1558_s26  ;;  %p55_p6 = scmp.eq.s32.totalorder %s54_s21, 0 }
  0x16   : > { %p64_p7 = scmp.ne.s32.totalorder %s1558_s26, %s1554_s25  ;;  %p65_p8 = scmp.eq.s32.totalorder %s1562_s27, 0 }
  0x17   : > { %p70_p9 = scmp.ne.s32.totalorder %s1554_s25, %s1550_s24  ;;  %p199_p12 = scmp.eq.s32.totalorder %s1647_s8, 2 }
  0x18   : > { %s1676_s23 = scalar_select %p55_p6, %s1558_s26, %s57_s22  }
  0x19   : > { %p1678_p10 = por %p65_p8, %p64_p7  ;;  %p1684_p11 = por %p71_p1, %p70_p9 }
  0x1a   : > { %p205_p13 = scmp.eq.s32.totalorder %s1242_s19, 2  ;;  %p1303_p0 = scmp.lt.s32.totalorder %s1562_s27, 3 }
  0x1b   : > { %s269_s30 = sand.u32 1, %s1558_s26   ;;  %p1691_p2 = por %p199_p12, %p64_p7 }
  0x1c   : > { %p1695_p4 = por %p205_p13, %p70_p9  ;;  %s1247_s12 = sshll.u32 %s269_s30, 3 }
  0x1d   : > { %s1248_s13 = sshll.u32 %s1562_s27, 3  ;;  %s273_s17 = scalar_lea.vmem [#allocation2], %s1247_s12 }
  0x1e   : > { %s277_s16 = scalar_lea.hbm %s2043_s1, %s1248_s13  ;;  %s281_s18 = sshll.u32 %s273_s17, 4  ;;  %s282_s18 = int_to_ptr.vmem [resolvable:$true] %s281_s18 }
  0x1f   : > { %s279_s21 = sshll.u32 %s277_s16, 4  ;;  %p1705_p5 = pnand %p1303_p0, %p1678_p10  ;;  %s280_s21 = int_to_ptr.hbm [resolvable:$true] %s279_s21 }
  0x20   : > { %s270_s22 = scalar_lea.sflag [#allocation3], %s269_s30  ;;  %s1462_s5 = sshra.s32 %s280_s21, 4  ;;  %s1463_s5 = int_to_ptr.hbm [resolvable:$true] %s1462_s5 }
  0x21   : > { %s1464_s6 = scalar_lea.hbm %s1463_s5, 8  ;;  %p1466_p7 = pneg %p1705_p5 }
  0x22   : > { %p1465_p6 = scmp.ne.s32.totalorder %s1463_s5, %s1464_s6  ;;  %s1469_s14 = scalar_lea.hbm %s2043_s1, 24 }
  0x23   : > { %p1470_p10 = scmp.lt.s32.totalorder %s1463_s5, %s2043_s1  ;;  %p1471_p12 = scmp.lt.s32.totalorder %s1469_s14, %s1464_s6 }
  0x24   : > { %p1467_p8 = pnand %p1466_p7, %p1465_p6 }
  0x25   : > { %p1472_p13 = por %p1471_p12, %p1470_p10 }
  0x26   : > { %p1468_p9 = pneg %p1467_p8 }
  0x28   : > { %p1473_p0 = pnand %p1472_p13, %p1468_p9 }
  0x2a   : > { %1476 = shalt.err (!%p1473_p0)
}
  0x2b   : > { %1296 = dma.hbm_to_vmem [thread:$0]  (!%p1705_p5), %s280_s21, 128, %s282_s18, %s270_s22  }
  0x2c   : > { %290 = sbr.rel (%p1652_p3) target bundleno = 977 (0x3d1), region = 48  ;;  %s1722_s30 = sand.u32 (!%p1652_p3), 1, %s1554_s25  }
  0x2d   : > { %s1250_s16 = sshll.u32 (!%p1652_p3), %s1722_s30, 3  ;;  %s293_s17 = scalar_lea.sflag (!%p1652_p3), [#allocation3], %s1722_s30 }
  0x2e   : > { %s1726_s12 = scalar_lea.vmem (!%p1652_p3), [#allocation2], %s1250_s16 }
  0x31   : > { %1537 = dma.done.wait (%p1684_p11), %s293_s17, 128  }
  0x32   : > { %1539 = vsyncadd (%p1684_p11), %s293_s17, 4294967168 }
  0x33   : > { %1541 = dma.done.wait (%p71_p1), [#allocation6], 1024  }
  0x34   : > { %1543 = vsyncadd (%p71_p1), [#allocation6], 4294966272  ;;  %p342_p3 = scmp.lt.s32.totalorder %s1647_s8, 2  ;;  %v1568_v0 = vmov 2   ;;  %v1569_v1 = vmov 0   ;;  %v1570_v2 = vmov 6  }
  0x35   : > { %1358 = vset.pattern.permute.xlu0 %v1568_v0  ;;  %1360 = vset.pattern.permute.xlu1 %v1569_v1  ;;  %v1571_v4 = vmov 3   ;;  %v1572_v5 = vmov 1   ;;  %v1573_v6 = vmov 7   ;;  %v1574_v7 = vmov 4   ;;  %v356_v13 = vld [vmem:[%s2046_s4 + $0x18] sm:$0xff]  ;;  %v355_v14 = vld [vmem:[%s2046_s4 + $0x10] sm:$0xff] }
  0x36   : > { %s343_s5 = scalar_select %p342_p3, %s1647_s8, 2  ;;  %1362 = vset.pattern.permute.xlu2 %v1570_v2  ;;  %v1575_v8 = vmov 10   ;;  %v1576_v9 = vmov 5   ;;  %v1577_v10 = vmov 11   ;;  %v1578_v11 = vmov 8   ;;  %423 = vmatpush.msra.mxu1 %v356_v13  ;;  %v354_v15 = vld [vmem:[%s2046_s4 + $0x8] sm:$0xff] }
  0x37   : > { %v1579_v12 = vmov 9   ;;  %545 = vmatpush.msra.mxu3 %v356_v13  ;;  %v353_v16 = vld [vmem:[%s2046_s4] sm:$0xff]  ;;  %vm366_vm0 = vcmask 261120   ;;  %s1253_s16 = sshll.u32 %s1722_s30, 4  ;;  %s1582_s9 = smov 96  }
  0x38   : > { %s1254_s6 = sshll.u32 %s343_s5, 3  ;;  %424 = vmatpush.msra.mxu1 %v355_v14  ;;  %v1371_v21 = vld [vmem:[%s2044_s2] ss:$0 sm:$0xff]  ;;  %v1372_v22 = vld [vmem:[%s2044_s2 + $0x1] ss:$0 sm:$0xff]  ;;  %s1978_s17 = scalar_lea.vmem [#allocation8], %s1253_s16 }
  0x39   : > { %s345_s18 = scalar_lea.vmem %s2042_s0, %s1254_s6  ;;  %546 = vmatpush.msra.mxu3 %v355_v14  ;;  %v1373_v29 = vld [vmem:[%s2045_s3] ss:$0 sm:$0xff]  ;;  %s1580_s5 = smov 32  }
  0x3a   : > { %v515_v3 = vld [vmem:[%s345_s18] sm:$0xff]  ;;  %425 = vmatpush.msra.mxu1 %v354_v15  ;;  %s1581_s6 = smov 64   ;;  %s1273_s29 = sshll.u32 %s1647_s8, 4 }
  0x3b   : > { %518 = vperm.xlu0 %1358, %v515_v3   ;;  %393 = vperm.xlu1 %1360, %v515_v3   ;;  %s1136_s21 = scalar_lea.hbm %s2049_s7, %s1273_s29  ;;  %s1138_s19 = sshll.u32 %s1978_s17, 4  ;;  %s1139_s19 = int_to_ptr.vmem [resolvable:$true] %s1138_s19 }
  0x3c   : > { %764 = vperm.xlu2 %1362, %v515_v3   ;;  %547 = vmatpush.msra.mxu3 %v354_v15  ;;  %s1140_s22 = sshll.u32 %s1136_s21, 4  ;;  %s1125_s8 = scalar_lea.sflag [#allocation4], %s1722_s30  ;;  %s1141_s22 = int_to_ptr.hbm [resolvable:$true] %s1140_s22 }
  0x3d   : > { %426 = vmatpush.msra.mxu1 %v353_v16  ;;  %s1506_s13 = sshra.s32 %s1141_s22, 4  ;;  %s1512_s16 = scalar_lea.hbm %s2049_s7, 48  ;;  %s1507_s13 = int_to_ptr.hbm [resolvable:$true] %s1506_s13 }
  0x3e   : > { %548 = vmatpush.msra.mxu3 %v353_v16  ;;  %s1508_s14 = scalar_lea.hbm %s1507_s13, 16  ;;  %p1513_p6 = scmp.lt.s32.totalorder %s1507_s13, %s2049_s7 }
  0x3f   : > { %668 = vmatpush.msrb.mxu1 %v356_v13  ;;  %p1509_p1 = scmp.ne.s32.totalorder %s1507_s13, %s1508_s14  ;;  %p1514_p7 = scmp.lt.s32.totalorder %s1512_s16, %s1508_s14 }
  0x40   : > { %791 = vmatpush.msrb.mxu3 %v356_v13 }
  0x41   : > { %669 = vmatpush.msrb.mxu1 %v355_v14  ;;  %p1510_p11 = pnand %p1509_p1, %p1691_p2  ;;  %p1515_p8 = por %p1514_p7, %p1513_p6 }
  0x42   : > { %792 = vmatpush.msrb.mxu3 %v355_v14 }
  0x43   : > { %1359 = vset.pattern.permute.xlu0 %v1571_v4  ;;  %1361 = vset.pattern.permute.xlu1 %v1572_v5  ;;  %p1511_p5 = pneg %p1510_p11 }
  0x44   : > { %523 = vperm.xlu0 %1359, %v515_v3   ;;  %399 = vperm.xlu1 %1361, %v515_v3  }
  0x45   : > { %1363 = vset.pattern.permute.xlu2 %v1573_v6  ;;  %793 = vmatpush.msrb.mxu3 %v354_v15  ;;  %p1516_p9 = pnand %p1515_p8, %p1511_p5 }
  0x46   : > { %769 = vperm.xlu2 %1363, %v515_v3   ;;  %670 = vmatpush.msrb.mxu1 %v354_v15 }
  0x47   : > { %794 = vmatpush.msrb.mxu3 %v353_v16 }
  0x48   : > { %671 = vmatpush.msrb.mxu1 %v353_v16 }
  0x4c   : > { %1364 = vset.pattern.permute.xlu1 %v1574_v7  ;;  %1366 = vset.pattern.permute.xlu0 %v1575_v8 }
  0x4d   : > { %641 = vperm.xlu1 %1364, %v515_v3   ;;  %1005 = vperm.xlu0 %1366, %v515_v3  }
  0x4e   : > { %1365 = vset.pattern.permute.xlu2 %v1576_v9 }
  0x4f   : > { %646 = vperm.xlu2 %1365, %v515_v3  }
  0x55   : > { %1367 = vset.pattern.permute.xlu1 %v1577_v10  ;;  %1370 = vset.pattern.permute.xlu0 %v1577_v10 }
  0x56   : > { %1010 = vperm.xlu1 %1367, %v515_v3  }
  0x57   : > { %1368 = vset.pattern.permute.xlu2 %v1578_v11 }
  0x58   : > { %887 = vperm.xlu2 %1368, %v515_v3  }
  0x5e   : > { %1369 = vset.pattern.permute.xlu1 %v1579_v12 }
  0x5f   : > { %892 = vperm.xlu1 %1369, %v515_v3  }
  0x96   : > { %v765_v17 = vpop.permute.xlu2 %764 }
  0x97   : > { %v767_v30 = vmul.f32 %v1371_v21, %v765_v17 }
  0xa0   : > { %v770_v20 = vpop.permute.xlu2 %769 }
  0xa1   : > { %v772_v33 = vmul.f32 %v1372_v22, %v770_v20 }
  0xa3   : > { %v773_v37 = vadd.f32 %v772_v33, %v767_v30  ;;  %v364_v30 = vld [vmem:[#allocation7 + $0x10] sm:$0xff]  ;;  %v363_v33 = vld [vmem:[#allocation7 + $0x8] sm:$0xff] }
  0xa5   : > { %v774_v43 = vadd.f32 %v1373_v29, %v773_v37 }
  0xa7   : > { %v775_v47 = vmax.f32 %v774_v43, 0.0 }
  0xa9   : > { %v647_v34 = vpop.permute.xlu2 %646 }
  0xaa   : > { %v649_v40 = vmul.f32 %v1372_v22, %v647_v34  ;;  %v1823_v34 = vld [vmem:[#allocation5] sm:$0xff] }
  0xad   : > { %v394_v18 = vpop.permute.xlu1 %393  ;;  %v519_v19 = vpop.permute.xlu0 %518 }
  0xae   : > { %v397_v25 = vmul.f32 %v1371_v21, %v394_v18  ;;  %v521_v26 = vmul.f32 %v1371_v21, %v519_v19 }
  0xb2   : > { %v888_v54 = vpop.permute.xlu2 %887 }
  0xb3   : > { %v890_v56 = vmul.f32 %v1371_v21, %v888_v54 }
  0xb6   : > { %v524_v23 = vpop.permute.xlu0 %523  ;;  %v400_v24 = vpop.permute.xlu1 %399 }
  0xb7   : > { %v526_v27 = vmul.f32 %v1372_v22, %v524_v23  ;;  %v403_v28 = vmul.f32 %v1372_v22, %v400_v24 }
  0xb9   : > { %v527_v31 = vadd.f32 %v526_v27, %v521_v26  ;;  %v404_v32 = vadd.f32 %v403_v28, %v397_v25  ;;  %v365_v25 = vld [vmem:[#allocation7 + $0x18] sm:$0xff]  ;;  %v1815_v26 = vld [vmem:[#allocation5 + $0x10] sm:$0xff] }
  0xba   : > { %382 = vmatpush.msra.mxu0 %v365_v25 }
  0xbb   : > { %v406_v35 = vadd.f32 %v1373_v29, %v404_v32  ;;  %v528_v36 = vadd.f32 %v1373_v29, %v527_v31  ;;  %v1820_v31 = vld [vmem:[#allocation5 + $0x8] sm:$0xff] }
  0xbc   : > { %383 = vmatpush.msra.mxu0 %v364_v30 }
  0xbd   : > { %v407_v38 = vmax.f32 %v406_v35, 0.0  ;;  %v529_v39 = vmax.f32 %v528_v36, 0.0  ;;  %v362_v36 = vld [vmem:[#allocation7] sm:$0xff] }
  0xbe   : > { %384 = vmatpush.msra.mxu0 %v363_v33 }
  0xbf   : > { %v642_v41 = vpop.permute.xlu1 %641  ;;  %1256 = vmatmul.msk.f32.vlgmr.msra.gmra.mxu1 %vm366_vm0, %v407_v38  ;;  %1258 = vmatmul.msk.f32.vlgmr.msra.gmra.mxu3 %vm366_vm0, %v529_v39  ;;  %v1006_v46 = vpop.permute.xlu0 %1005  ;;  %v361_v38 = vld [vmem:[%s1726_s12] sm:$0xff] }
  0xc0   : > { %v644_v42 = vmul.f32 %v1371_v21, %v642_v41  ;;  %1032 = vmatpush.msra.mxu3 %v356_v13  ;;  %914 = vmatpush.msra.mxu1 %v356_v13  ;;  %v1008_v49 = vmul.f32 %v1371_v21, %v1006_v46 }
  0xc1   : > { %385 = vmatpush.msra.mxu0 %v362_v36 }
  0xc2   : > { %v650_v44 = vadd.f32 %v649_v40, %v644_v42  ;;  %1033 = vmatpush.msra.mxu3 %v355_v14  ;;  %915 = vmatpush.msra.mxu1 %v355_v14 }
  0xc3   : > { %1255 = vmatmul.msk.f32.vlgmr.msra.gmra.mxu0 %vm366_vm0, %v361_v38 }
  0xc4   : > { %v651_v45 = vadd.f32 %v1373_v29, %v650_v44  ;;  %1034 = vmatpush.msra.mxu3 %v354_v15  ;;  %916 = vmatpush.msra.mxu1 %v354_v15 }
  0xc6   : > { %v652_v48 = vmax.f32 %v651_v45, 0.0  ;;  %1035 = vmatpush.msra.mxu3 %v353_v16  ;;  %917 = vmatpush.msra.mxu1 %v353_v16 }
  0xc7   : > { %1262 = vmatmul.msk.f32.vlgmr.msrb.gmra.mxu3 %vm366_vm0, %v775_v47 }
  0xc8   : > { %v1011_v50 = vpop.permute.xlu1 %1010  ;;  %1260 = vmatmul.msk.f32.vlgmr.msrb.gmra.mxu1 %vm366_vm0, %v652_v48 }
  0xc9   : > { %v1013_v51 = vmul.f32 %v1372_v22, %v1011_v50 }
  0xcb   : > { %v1014_v52 = vadd.f32 %v1013_v51, %v1008_v49 }
  0xcd   : > { %v1015_v53 = vadd.f32 %v1373_v29, %v1014_v52 }
  0xcf   : > { %v1016_v55 = vmax.f32 %v1015_v53, 0.0 }
  0xd1   : > { %1266 = vmatmul.msk.f32.vlgmr.msra.gmra.mxu3 %vm366_vm0, %v1016_v55  ;;  %v893_v57 = vpop.permute.xlu1 %892 }
  0xd2   : > { %v895_v58 = vmul.f32 %v1372_v22, %v893_v57  ;;  %v1810_v22 = vld [vmem:[#allocation5 + $0x18] sm:$0xff] }
  0xd3   : > { %476 = vmatpush.msra.mxu2 %v1810_v22  ;;  %596 = vmatpush.msrb.mxu0 %v1810_v22 }
  0xd4   : > { %v896_v59 = vadd.f32 %v895_v58, %v890_v56 }
  0xd5   : > { %477 = vmatpush.msra.mxu2 %v1815_v26  ;;  %597 = vmatpush.msrb.mxu0 %v1815_v26 }
  0xd6   : > { %v897_v60 = vadd.f32 %v1373_v29, %v896_v59 }
  0xd7   : > { %478 = vmatpush.msra.mxu2 %v1820_v31  ;;  %598 = vmatpush.msrb.mxu0 %v1820_v31 }
  0xd8   : > { %v898_v61 = vmax.f32 %v897_v60, 0.0 }
  0xd9   : > { %479 = vmatpush.msra.mxu2 %v1823_v34  ;;  %599 = vmatpush.msrb.mxu0 %v1823_v34 }
  0xda   : > { %1264 = vmatmul.msk.f32.vlgmr.msra.gmra.mxu1 %vm366_vm0, %v898_v61 }
  0xdb   : > { %719 = vmatpush.msrb.mxu2 %v1810_v22  ;;  %842 = vmatpush.msra.mxu0 %v1810_v22 }
  0xdd   : > { %720 = vmatpush.msrb.mxu2 %v1815_v26  ;;  %843 = vmatpush.msra.mxu0 %v1815_v26 }
  0xdf   : > { %721 = vmatpush.msrb.mxu2 %v1820_v31  ;;  %844 = vmatpush.msra.mxu0 %v1820_v31 }
  0xe1   : > { %722 = vmatpush.msrb.mxu2 %v1823_v34  ;;  %845 = vmatpush.msra.mxu0 %v1823_v34 }
 0x13c   : > { %v1768_v62 = vpop.f32.mrf.mxu1 }
 0x13d   : > { %v431_v63 = vsel %vm366_vm0, %v1768_v62, 0.0  ;;  %v434_v0 = vmul.f32 %v1768_v62, %v1768_v62 }
 0x13e   : > { %432 = vadd.xlane.f32.xlu0 %v431_v63 }
 0x13f   : > { %v435_v1 = vsel %vm366_vm0, %v434_v0, 0.0 }
 0x140   : > { %436 = vadd.xlane.f32.xlu2 %v435_v1 }
 0x142   : > { %v1775_v2 = vpop.f32.mrf.mxu3 }
 0x143   : > { %v556_v3 = vmul.f32 %v1775_v2, %v1775_v2  ;;  %v553_v7 = vsel %vm366_vm0, %v1775_v2, 0.0 }
 0x145   : > { %v1779_v4 = vpop.f32.mrf.mxu1  ;;  %v557_v5 = vsel %vm366_vm0, %v556_v3, 0.0 }
 0x146   : > { %558 = vadd.xlane.f32.xlu1 %v557_v5  ;;  %v676_v6 = vsel %vm366_vm0, %v1779_v4, 0.0  ;;  %v679_v12 = vmul.f32 %v1779_v4, %v1779_v4 }
 0x147   : > { %677 = vadd.xlane.f32.xlu0 %v676_v6 }
 0x148   : > { %554 = vadd.xlane.f32.xlu2 %v553_v7  ;;  %v680_v16 = vsel %vm366_vm0, %v679_v12, 0.0 }
 0x14a   : > { %v1786_v8 = vpop.f32.mrf.mxu3 }
 0x14b   : > { %v802_v9 = vmul.f32 %v1786_v8, %v1786_v8  ;;  %v799_v11 = vsel %vm366_vm0, %v1786_v8, 0.0 }
 0x14d   : > { %v803_v10 = vsel %vm366_vm0, %v802_v9, 0.0  ;;  %v1859_v9 = vld [vmem:[%s2045_s3 + $0x1] ss:$0 sm:$0xff] }
 0x14e   : > { %804 = vadd.xlane.f32.xlu1 %v803_v10 }
 0x150   : > { %800 = vadd.xlane.f32.xlu2 %v799_v11 }
 0x154   : > { %v1795_v13 = vpop.f32.mrf.mxu3 }
 0x155   : > { %v1043_v14 = vmul.f32 %v1795_v13, %v1795_v13  ;;  %v1040_v15 = vsel %vm366_vm0, %v1795_v13, 0.0 }
 0x156   : > { %1041 = vadd.xlane.f32.xlu0 %v1040_v15 }
 0x157   : > { %v1044_v17 = vsel %vm366_vm0, %v1043_v14, 0.0  ;;  %v1803_v18 = vpop.f32.mrf.mxu1 }
 0x158   : > { %1045 = vadd.xlane.f32.xlu1 %v1044_v17  ;;  %681 = vadd.xlane.f32.xlu2 %v680_v16  ;;  %v925_v19 = vmul.f32 %v1803_v18, %v1803_v18  ;;  %v922_v21 = vsel %vm366_vm0, %v1803_v18, 0.0  ;;  %v1866_v17 = vld [vmem:[%s2045_s3 + $0x2] ss:$0 sm:$0xff] }
 0x15a   : > { %v926_v20 = vsel %vm366_vm0, %v925_v19, 0.0 }
 0x15e   : > { %927 = vadd.xlane.f32.xlu0 %v926_v20 }
 0x160   : > { %923 = vadd.xlane.f32.xlu2 %v922_v21 }
 0x1b1   : > { %v433_v23 = vpop.xlane.xlu0 %432 }
 0x1b2   : > { %v1813_v24 = vmul.f32 0.03125, %v433_v23 }
 0x1b3   : > { %v437_v27 = vpop.xlane.xlu2 %436 }
 0x1b4   : > { %v440_v28 = vmul.f32 %v1813_v24, %v1813_v24  ;;  %v439_v29 = vmul.f32 0.03125, %v437_v27  ;;  %v443_v7 = vsub.f32 %v1768_v62, %v1813_v24 }
 0x1b6   : > { %v441_v32 = vsub.f32 %v439_v29, %v440_v28 }
 0x1b8   : > { %v442_v35 = vmax.f32 %v441_v32, 0.0 }
 0x1b9   : > { %v559_v37 = vpop.xlane.xlu1 %558 }
 0x1ba   : > { %v444_v39 = vadd.f32 1e-05, %v442_v35  ;;  %v561_v42 = vmul.f32 0.03125, %v559_v37  ;;  %v678_v45 = vpop.xlane.xlu0 %677 }
 0x1bb   : > { %v555_v40 = vpop.xlane.xlu2 %554  ;;  %v1848_v59 = vmul.f32 0.03125, %v678_v45 }
 0x1bc   : > { %1378 = vrsqrt.f32 %v444_v39  ;;  %v1831_v41 = vmul.f32 0.03125, %v555_v40  ;;  %vm451_vm2 = vweird.f32 %v444_v39 }
 0x1bd   : > { %v685_v1 = vmul.f32 %v1848_v59, %v1848_v59 }
 0x1be   : > { %v562_v43 = vmul.f32 %v1831_v41, %v1831_v41 }
 0x1c0   : > { %v563_v44 = vsub.f32 %v561_v42, %v562_v43  ;;  %v565_v43 = vsub.f32 %v1775_v2, %v1831_v41 }
 0x1c1   : > { %v805_v49 = vpop.xlane.xlu1 %804 }
 0x1c2   : > { %v1379_v46 = vpop.eup %1378  ;;  %v564_v47 = vmax.f32 %v563_v44, 0.0  ;;  %v807_v54 = vmul.f32 0.03125, %v805_v49 }
 0x1c3   : > { %v446_v48 = vmul.f32 %v1379_v46, %v444_v39  ;;  %v801_v50 = vpop.xlane.xlu2 %800  ;;  %vm452_vm1 = vweird.f32 %v1379_v46 }
 0x1c4   : > { %v566_v51 = vadd.f32 1e-05, %v564_v47  ;;  %v1841_v52 = vmul.f32 0.03125, %v801_v50  ;;  %vm453_vm3 = vmor %vm451_vm2, %vm452_vm1 }
 0x1c5   : > { %v447_v53 = vmul.f32 %v1379_v46, %v446_v48 }
 0x1c6   : > { %1380 = vrsqrt.f32 %v566_v51  ;;  %v808_v55 = vmul.f32 %v1841_v52, %v1841_v52  ;;  %vm573_vm5 = vweird.f32 %v566_v51 }
 0x1c7   : > { %v448_v56 = vmul.f32 0.5, %v447_v53 }
 0x1c8   : > { %v809_v57 = vsub.f32 %v807_v54, %v808_v55 }
 0x1c9   : > { %v449_v58 = vsub.f32 1.5, %v448_v56  ;;  %v1042_v60 = vpop.xlane.xlu0 %1041 }
 0x1ca   : > { %v810_v61 = vmax.f32 %v809_v57, 0.0  ;;  %v1850_v63 = vmul.f32 0.03125, %v1042_v60 }
 0x1cb   : > { %v450_v0 = vmul.f32 %v1379_v46, %v449_v58  ;;  %v1046_v3 = vpop.xlane.xlu1 %1045  ;;  %v682_v5 = vpop.xlane.xlu2 %681 }
 0x1cc   : > { %v1381_v6 = vpop.eup %1380  ;;  %v812_v10 = vadd.f32 1e-05, %v810_v61  ;;  %v1049_v11 = vmul.f32 %v1850_v63, %v1850_v63  ;;  %v1048_v12 = vmul.f32 0.03125, %v1046_v3  ;;  %v684_v15 = vmul.f32 0.03125, %v682_v5 }
 0x1cd   : > { %v568_v14 = vmul.f32 %v1381_v6, %v566_v51  ;;  %v454_v16 = vsel %vm453_vm3, %v1379_v46, %v450_v0  ;;  %vm574_vm4 = vweird.f32 %v1381_v6  ;;  %v811_v61 = vsub.f32 %v1786_v8, %v1841_v52 }
 0x1ce   : > { %1382 = vrsqrt.f32 %v812_v10  ;;  %v1050_v62 = vsub.f32 %v1048_v12, %v1049_v11  ;;  %v455_v19 = vmul.f32 %v454_v16, %v443_v7  ;;  %v686_v21 = vsub.f32 %v684_v15, %v685_v1  ;;  %vm575_vm6 = vmor %vm573_vm5, %vm574_vm4 }
 0x1cf   : > { %v569_v20 = vmul.f32 %v1381_v6, %v568_v14  ;;  %vm819_vm8 = vweird.f32 %v812_v10  ;;  %v1052_v16 = vsub.f32 %v1795_v13, %v1850_v63 }
 0x1d0   : > { %v1051_v23 = vmax.f32 %v1050_v62, 0.0  ;;  %v457_v24 = vmul.f32 %v1859_v9, %v455_v19  ;;  %v687_v27 = vmax.f32 %v686_v21, 0.0 }
 0x1d1   : > { %v570_v25 = vmul.f32 0.5, %v569_v20  ;;  %v928_v28 = vpop.xlane.xlu0 %927 }
 0x1d2   : > { %v1053_v29 = vadd.f32 1e-05, %v1051_v23  ;;  %v459_v30 = vadd.f32 %v1866_v17, %v457_v24  ;;  %v1870_v33 = vadd.f32 1e-05, %v687_v27  ;;  %v930_v38 = vmul.f32 0.03125, %v928_v28 }
 0x1d3   : > { %v571_v32 = vsub.f32 1.5, %v570_v25  ;;  %v924_v35 = vpop.xlane.xlu2 %923 }
 0x1d4   : > { %v1383_v36 = vpop.eup %1382  ;;  %1384 = vrsqrt.f32 %v1053_v29  ;;  %v1872_v37 = vmul.f32 0.03125, %v924_v35  ;;  %v460_v39 = vmax.f32 %v459_v30, 0.0  ;;  %vm1060_vm10 = vweird.f32 %v1053_v29 }
 0x1d5   : > { %v572_v40 = vmul.f32 %v1381_v6, %v571_v32  ;;  %v814_v42 = vmul.f32 %v1383_v36, %v812_v10  ;;  %1386 = vrsqrt.f32 %v1870_v33  ;;  %vm820_vm7 = vweird.f32 %v1383_v36 }
 0x1d6   : > { %v931_v44 = vmul.f32 %v1872_v37, %v1872_v37  ;;  %1257 = vmatmul.msk.f32.vlgmr.msra.gmra.mxu2 %vm366_vm0, %v460_v39  ;;  %vm821_vm9 = vmor %vm819_vm8, %vm820_vm7  ;;  %vm696_vm14 = vweird.f32 %v1870_v33  ;;  %v934_v28 = vsub.f32 %v1803_v18, %v1872_v37  ;;  %v387_v39 = vpop.f32.mrf.mxu0 }
 0x1d7   : > { %v576_v45 = vsel %vm575_vm6, %v1381_v6, %v572_v40  ;;  %v815_v46 = vmul.f32 %v1383_v36, %v814_v42  ;;  %965 = vmatpush.msra.mxu2 %v1810_v22 }
 0x1d8   : > { %v577_v47 = vmul.f32 %v576_v45, %v565_v43  ;;  %v932_v48 = vsub.f32 %v930_v38, %v931_v44 }
 0x1d9   : > { %v816_v49 = vmul.f32 0.5, %v815_v46  ;;  %966 = vmatpush.msra.mxu2 %v1815_v26 }
 0x1da   : > { %v1385_v50 = vpop.eup %1384  ;;  %v578_v51 = vmul.f32 %v1859_v9, %v577_v47  ;;  %v933_v53 = vmax.f32 %v932_v48, 0.0 }
 0x1db   : > { %v1387_v2 = vpop.eup %1386  ;;  %v817_v41 = vsub.f32 1.5, %v816_v49  ;;  %v1055_v54 = vmul.f32 %v1385_v50, %v1053_v29  ;;  %967 = vmatpush.msra.mxu2 %v1820_v31  ;;  %vm1061_vm11 = vweird.f32 %v1385_v50 }
 0x1dc   : > { %v691_v55 = vmul.f32 %v1387_v2, %v1870_v33  ;;  %v935_v56 = vadd.f32 1e-05, %v933_v53  ;;  %v579_v57 = vadd.f32 %v1866_v17, %v578_v51  ;;  %vm1892_vm12 = vmor %vm1060_vm10, %vm1061_vm11  ;;  %vm697_vm13 = vweird.f32 %v1387_v2 }
 0x1dd   : > { %v818_v58 = vmul.f32 %v1383_v36, %v817_v41  ;;  %v1056_v60 = vmul.f32 %v1385_v50, %v1055_v54  ;;  %968 = vmatpush.msra.mxu2 %v1823_v34  ;;  %vm698_vm15 = vmor %vm696_vm14, %vm697_vm13 }
 0x1de   : > { %v692_v0 = vmul.f32 %v1387_v2, %v691_v55  ;;  %1388 = vrsqrt.f32 %v935_v56  ;;  %v580_v1 = vmax.f32 %v579_v57, 0.0  ;;  %vm942_vm1 = vweird.f32 %v935_v56 }
 0x1df   : > { %v822_v3 = vsel %vm821_vm9, %v1383_v36, %v818_v58  ;;  %v1057_v5 = vmul.f32 0.5, %v1056_v60 }
 0x1e0   : > { %v823_v6 = vmul.f32 %v822_v3, %v811_v61  ;;  %v693_v7 = vmul.f32 0.5, %v692_v0  ;;  %1259 = vmatmul.msk.f32.vlgmr.msrb.gmra.mxu0 %vm366_vm0, %v580_v1 }
 0x1e1   : > { %v1058_v11 = vsub.f32 1.5, %v1057_v5  ;;  %1083 = vmatpush.msrb.mxu0 %v1810_v22  ;;  %v688_v22 = vsub.f32 %v1779_v4, %v1848_v59 }
 0x1e2   : > { %v824_v10 = vmul.f32 %v1859_v9, %v823_v6  ;;  %v694_v8 = vsub.f32 1.5, %v693_v7 }
 0x1e3   : > { %v1059_v52 = vmul.f32 %v1385_v50, %v1058_v11  ;;  %1084 = vmatpush.msrb.mxu0 %v1815_v26 }
 0x1e4   : > { %v1389_v14 = vpop.eup %1388  ;;  %v825_v15 = vadd.f32 %v1866_v17, %v824_v10  ;;  %v695_v62 = vmul.f32 %v1387_v2, %v694_v8 }
 0x1e5   : > { %v1063_v19 = vsel %vm1892_vm12, %v1385_v50, %v1059_v52  ;;  %v937_v20 = vmul.f32 %v1389_v14, %v935_v56  ;;  %1085 = vmatpush.msrb.mxu0 %v1820_v31  ;;  %vm943_vm2 = vweird.f32 %v1389_v14 }
 0x1e6   : > { %v826_v26 = vmax.f32 %v825_v15, 0.0  ;;  %v1064_v21 = vmul.f32 %v1063_v19, %v1052_v16  ;;  %v699_v23 = vsel %vm698_vm15, %v1387_v2, %v695_v62  ;;  %vm944_vm3 = vmor %vm942_vm1, %vm943_vm2 }
 0x1e7   : > { %v938_v24 = vmul.f32 %v1389_v14, %v937_v20  ;;  %v700_v25 = vmul.f32 %v699_v23, %v688_v22  ;;  %1086 = vmatpush.msrb.mxu0 %v1823_v34 }
 0x1e8   : > { %v1065_v13 = vmul.f32 %v1859_v9, %v1064_v21  ;;  %1263 = vmatmul.msk.f32.vlgmr.msra.gmra.mxu0 %vm366_vm0, %v826_v26 }
 0x1e9   : > { %v939_v63 = vmul.f32 0.5, %v938_v24  ;;  %v701_v4 = vmul.f32 %v1859_v9, %v700_v25 }
 0x1ea   : > { %v1066_v59 = vadd.f32 %v1866_v17, %v1065_v13 }
 0x1eb   : > { %v940_v27 = vsub.f32 1.5, %v939_v63  ;;  %v702_v31 = vadd.f32 %v1866_v17, %v701_v4 }
 0x1ec   : > { %v1067_v30 = vmax.f32 %v1066_v59, 0.0 }
 0x1ed   : > { %v941_v29 = vmul.f32 %v1389_v14, %v940_v27  ;;  %v703_v34 = vmax.f32 %v702_v31, 0.0 }
 0x1ef   : > { %v945_v32 = vsel %vm944_vm3, %v1389_v14, %v941_v29  ;;  %1261 = vmatmul.msk.f32.vlgmr.msrb.gmra.mxu2 %vm366_vm0, %v703_v34 }
 0x1f0   : > { %v946_v33 = vmul.f32 %v945_v32, %v934_v28  ;;  %1267 = vmatmul.msk.f32.vlgmr.msrb.gmra.mxu0 %vm366_vm0, %v1067_v30  ;;  %v1964_v30 = vld [vmem:[%s2045_s3 + $0x3] ss:$0 sm:$0xff] }
 0x1f2   : > { %v947_v35 = vmul.f32 %v1859_v9, %v946_v33 }
 0x1f4   : > { %v948_v36 = vadd.f32 %v1866_v17, %v947_v35 }
 0x1f6   : > { %v949_v38 = vmax.f32 %v948_v36, 0.0 }
 0x1f8   : > { %1265 = vmatmul.msk.f32.vlgmr.msra.gmra.mxu2 %vm366_vm0, %v949_v38  ;;  %v1971_v38 = vld [vmem:[%s2045_s3 + $0x4] ss:$0 sm:$0xff] }
 0x259   : > { %v481_v40 = vpop.f32.mrf.mxu2 }
 0x25a   : > { %v1919_v18 = vadd.f32 %v481_v40, %v387_v39 }
 0x25c   : > { %v484_v37 = vsel %vm366_vm0, %v1919_v18, 0.0  ;;  %v487_v42 = vmul.f32 %v1919_v18, %v1919_v18 }
 0x25d   : > { %v601_v43 = vpop.f32.mrf.mxu0  ;;  %485 = vadd.xlane.f32.xlu1 %v484_v37 }
 0x25e   : > { %v1925_v44 = vadd.f32 %v601_v43, %v387_v39  ;;  %v488_v9 = vsel %vm366_vm0, %v487_v42, 0.0 }
 0x25f   : > { %489 = vadd.xlane.f32.xlu2 %v488_v9 }
 0x260   : > { %v604_v17 = vsel %vm366_vm0, %v1925_v44, 0.0  ;;  %v607_v45 = vmul.f32 %v1925_v44, %v1925_v44 }
 0x261   : > { %605 = vadd.xlane.f32.xlu0 %v604_v17 }
 0x262   : > { %v608_v46 = vsel %vm366_vm0, %v607_v45, 0.0 }
 0x265   : > { %v847_v47 = vpop.f32.mrf.mxu0  ;;  %609 = vadd.xlane.f32.xlu1 %v608_v46 }
 0x266   : > { %v1933_v48 = vadd.f32 %v847_v47, %v387_v39 }
 0x268   : > { %v850_v49 = vsel %vm366_vm0, %v1933_v48, 0.0  ;;  %v853_v61 = vmul.f32 %v1933_v48, %v1933_v48 }
 0x26a   : > { %v854_v1 = vsel %vm366_vm0, %v853_v61, 0.0 }
 0x26d   : > { %851 = vadd.xlane.f32.xlu1 %v850_v49  ;;  %v1088_v53 = vpop.f32.mrf.mxu0 }
 0x26e   : > { %v1943_v54 = vadd.f32 %v1088_v53, %v387_v39 }
 0x270   : > { %v1094_v56 = vmul.f32 %v1943_v54, %v1943_v54  ;;  %v1091_v57 = vsel %vm366_vm0, %v1943_v54, 0.0 }
 0x272   : > { %v724_v50 = vpop.f32.mrf.mxu2  ;;  %v1095_v58 = vsel %vm366_vm0, %v1094_v56, 0.0 }
 0x273   : > { %v1937_v51 = vadd.f32 %v724_v50, %v387_v39 }
 0x275   : > { %v727_v2 = vsel %vm366_vm0, %v1937_v51, 0.0  ;;  %v730_v41 = vmul.f32 %v1937_v51, %v1937_v51 }
 0x276   : > { %728 = vadd.xlane.f32.xlu0 %v727_v2 }
 0x277   : > { %v731_v55 = vsel %vm366_vm0, %v730_v41, 0.0 }
 0x278   : > { %732 = vadd.xlane.f32.xlu1 %v731_v55 }
 0x27b   : > { %v970_v60 = vpop.f32.mrf.mxu2 }
 0x27c   : > { %v1953_v0 = vadd.f32 %v970_v60, %v387_v39 }
 0x27e   : > { %1092 = vadd.xlane.f32.xlu0 %v1091_v57  ;;  %v973_v3 = vsel %vm366_vm0, %v1953_v0, 0.0 }
 0x280   : > { %1096 = vadd.xlane.f32.xlu1 %v1095_v58 }
 0x286   : > { %855 = vadd.xlane.f32.xlu0 %v854_v1 }
 0x288   : > { %974 = vadd.xlane.f32.xlu1 %v973_v3 }
 0x2d0   : > { %v486_v5 = vpop.xlane.xlu1 %485 }
 0x2d1   : > { %v491_v6 = vmul.f32 0.03125, %v486_v5 }
 0x2d2   : > { %v490_v7 = vpop.xlane.xlu2 %489 }
 0x2d3   : > { %v493_v11 = vmul.f32 %v491_v6, %v491_v6  ;;  %v492_v10 = vmul.f32 0.03125, %v490_v7  ;;  %v496_v34 = vsub.f32 %v1919_v18, %v491_v6 }
 0x2d4   : > { %v606_v12 = vpop.xlane.xlu0 %605 }
 0x2d5   : > { %v494_v8 = vsub.f32 %v492_v10, %v493_v11  ;;  %v611_v52 = vmul.f32 0.03125, %v606_v12 }
 0x2d7   : > { %v495_v14 = vmax.f32 %v494_v8, 0.0  ;;  %v613_v62 = vmul.f32 %v611_v52, %v611_v52  ;;  %v616_v17 = vsub.f32 %v1925_v44, %v611_v52 }
 0x2d8   : > { %v610_v15 = vpop.xlane.xlu1 %609 }
 0x2d9   : > { %v497_v16 = vadd.f32 1e-05, %v495_v14  ;;  %v612_v22 = vmul.f32 0.03125, %v610_v15 }
 0x2db   : > { %1390 = vrsqrt.f32 %v497_v16  ;;  %v614_v19 = vsub.f32 %v612_v22, %v613_v62  ;;  %vm504_vm5 = vweird.f32 %v497_v16 }
 0x2dd   : > { %v615_v20 = vmax.f32 %v614_v19, 0.0 }
 0x2df   : > { %v617_v26 = vadd.f32 1e-05, %v615_v20 }
 0x2e0   : > { %v852_v24 = vpop.xlane.xlu1 %851 }
 0x2e1   : > { %v1391_v21 = vpop.eup %1390  ;;  %1392 = vrsqrt.f32 %v617_v26  ;;  %vm624_vm8 = vweird.f32 %v617_v26  ;;  %v857_v58 = vmul.f32 0.03125, %v852_v24 }
 0x2e2   : > { %v499_v23 = vmul.f32 %v1391_v21, %v497_v16  ;;  %vm505_vm4 = vweird.f32 %v1391_v21 }
 0x2e3   : > { %vm506_vm6 = vmor %vm504_vm5, %vm505_vm4  ;;  %v859_v11 = vmul.f32 %v857_v58, %v857_v58  ;;  %vm636_vm4 = vcmask 523520   ;;  %vm759_vm5 = vcmask 785920  }
 0x2e4   : > { %v500_v25 = vmul.f32 %v1391_v21, %v499_v23 }
 0x2e6   : > { %v501_v13 = vmul.f32 0.5, %v500_v25 }
 0x2e7   : > { %v1393_v63 = vpop.eup %1392 }
 0x2e8   : > { %v502_v4 = vsub.f32 1.5, %v501_v13  ;;  %v619_v59 = vmul.f32 %v1393_v63, %v617_v26  ;;  %vm625_vm7 = vweird.f32 %v1393_v63 }
 0x2e9   : > { %v729_v27 = vpop.xlane.xlu0 %728  ;;  %vm626_vm9 = vmor %vm624_vm8, %vm625_vm7 }
 0x2ea   : > { %v503_v31 = vmul.f32 %v1391_v21, %v502_v4  ;;  %v620_v28 = vmul.f32 %v1393_v63, %v619_v59  ;;  %v1958_v29 = vmul.f32 0.03125, %v729_v27 }
 0x2eb   : > { %v733_v32 = vpop.xlane.xlu1 %732 }
 0x2ec   : > { %v507_v33 = vsel %vm506_vm6, %v1391_v21, %v503_v31  ;;  %v621_v35 = vmul.f32 0.5, %v620_v28  ;;  %v736_v36 = vmul.f32 %v1958_v29, %v1958_v29  ;;  %v735_v40 = vmul.f32 0.03125, %v733_v32 }
 0x2ed   : > { %v508_v39 = vmul.f32 %v507_v33, %v496_v34  ;;  %v739_v20 = vsub.f32 %v1937_v51, %v1958_v29  ;;  %vm882_vm6 = vcmask 1048320  }
 0x2ee   : > { %v622_v18 = vsub.f32 1.5, %v621_v35  ;;  %v737_v42 = vsub.f32 %v735_v40, %v736_v36  ;;  %v862_v40 = vsub.f32 %v1933_v48, %v857_v58 }
 0x2ef   : > { %v510_v37 = vmul.f32 %v1964_v30, %v508_v39 }
 0x2f0   : > { %v623_v43 = vmul.f32 %v1393_v63, %v622_v18  ;;  %v738_v45 = vmax.f32 %v737_v42, 0.0 }
 0x2f1   : > { %v512_v9 = vadd.f32 %v1971_v38, %v510_v37  ;;  %v1093_v46 = vpop.xlane.xlu0 %1092 }
 0x2f2   : > { %v1098_v47 = vmul.f32 0.03125, %v1093_v46  ;;  %v627_v49 = vsel %vm626_vm9, %v1393_v63, %v623_v43  ;;  %v740_v53 = vadd.f32 1e-05, %v738_v45 }
 0x2f3   : > { %v513_v50 = vmax.f32 %v512_v9, 0.0  ;;  %v1097_v2 = vpop.xlane.xlu1 %1096  ;;  %v628_v41 = vmul.f32 %v627_v49, %v616_v17  ;;  %v976_v17 = vmul.f32 %v1953_v0, %v1953_v0 }
 0x2f4   : > { %v1100_v55 = vmul.f32 %v1098_v47, %v1098_v47  ;;  %v1099_v56 = vmul.f32 0.03125, %v1097_v2  ;;  %1394 = vrsqrt.f32 %v740_v53  ;;  %vm747_vm11 = vweird.f32 %v740_v53 }
 0x2f5   : > { %v629_v57 = vmul.f32 %v1964_v30, %v628_v41  ;;  %514 = vst.msk [vmem:[%s1978_s17] sm:$0xff] %vm366_vm0, %v513_v50  ;;  %v1103_v31 = vsub.f32 %v1943_v54, %v1098_v47  ;;  %v977_v48 = vsel %vm366_vm0, %v976_v17, 0.0 }
 0x2f6   : > { %v1101_v44 = vsub.f32 %v1099_v56, %v1100_v55 }
 0x2f7   : > { %v630_v60 = vadd.f32 %v1971_v38, %v629_v57 }
 0x2f8   : > { %v1102_v61 = vmax.f32 %v1101_v44, 0.0 }
 0x2f9   : > { %v856_v1 = vpop.xlane.xlu0 %855  ;;  %v631_v3 = vmax.f32 %v630_v60, 0.0 }
 0x2fa   : > { %v1104_v5 = vadd.f32 1e-05, %v1102_v61  ;;  %v858_v6 = vmul.f32 0.03125, %v856_v1  ;;  %v1395_v7 = vpop.eup %1394 }
 0x2fb   : > { %633 = vrot.lane.b32.xlu2 %v631_v3, %s1580_s5  ;;  %v742_v10 = vmul.f32 %v1395_v7, %v740_v53  ;;  %vm748_vm10 = vweird.f32 %v1395_v7  ;;  %v975_v49 = vpop.xlane.xlu1 %974 }
 0x2fc   : > { %1396 = vrsqrt.f32 %v1104_v5  ;;  %v860_v12 = vsub.f32 %v858_v6, %v859_v11  ;;  %vm749_vm12 = vmor %vm747_vm11, %vm748_vm10  ;;  %vm1111_vm14 = vweird.f32 %v1104_v5  ;;  %v980_v50 = vmul.f32 0.03125, %v975_v49 }
 0x2fd   : > { %v743_v8 = vmul.f32 %v1395_v7, %v742_v10 }
 0x2fe   : > { %v861_v52 = vmax.f32 %v860_v12, 0.0  ;;  %v982_v2 = vmul.f32 %v980_v50, %v980_v50 }
 0x2ff   : > { %v744_v14 = vmul.f32 0.5, %v743_v8 }
 0x300   : > { %v863_v15 = vadd.f32 1e-05, %v861_v52 }
 0x301   : > { %v745_v62 = vsub.f32 1.5, %v744_v14 }
 0x302   : > { %v1397_v16 = vpop.eup %1396  ;;  %1398 = vrsqrt.f32 %v863_v15  ;;  %vm870_vm2 = vweird.f32 %v863_v15 }
 0x303   : > { %v1106_v22 = vmul.f32 %v1397_v16, %v1104_v5  ;;  %v746_v19 = vmul.f32 %v1395_v7, %v745_v62  ;;  %vm1112_vm13 = vweird.f32 %v1397_v16  ;;  %v985_v5 = vsub.f32 %v1953_v0, %v980_v50 }
 0x304   : > { %vm1113_vm15 = vmor %vm1111_vm14, %vm1112_vm13 }
 0x305   : > { %v1107_v26 = vmul.f32 %v1397_v16, %v1106_v22  ;;  %v750_v21 = vsel %vm749_vm12, %v1395_v7, %v746_v19 }
 0x306   : > { %v751_v24 = vmul.f32 %v750_v21, %v739_v20 }
 0x307   : > { %v1108_v23 = vmul.f32 0.5, %v1107_v26 }
 0x308   : > { %v1399_v25 = vpop.eup %1398  ;;  %v752_v63 = vmul.f32 %v1964_v30, %v751_v24 }
 0x309   : > { %v1109_v13 = vsub.f32 1.5, %v1108_v23  ;;  %v865_v4 = vmul.f32 %v1399_v25, %v863_v15  ;;  %vm871_vm1 = vweird.f32 %v1399_v25 }
 0x30a   : > { %v753_v27 = vadd.f32 %v1971_v38, %v752_v63  ;;  %vm872_vm3 = vmor %vm870_vm2, %vm871_vm1 }
 0x30b   : > { %v1110_v59 = vmul.f32 %v1397_v16, %v1109_v13  ;;  %v866_v28 = vmul.f32 %v1399_v25, %v865_v4 }
 0x30c   : > { %v754_v51 = vmax.f32 %v753_v27, 0.0 }
 0x30d   : > { %v1114_v29 = vsel %vm1113_vm15, %v1397_v16, %v1110_v59  ;;  %v867_v34 = vmul.f32 0.5, %v866_v28 }
 0x30e   : > { %v1115_v32 = vmul.f32 %v1114_v29, %v1103_v31  ;;  %756 = vrot.lane.b32.xlu2 %v754_v51, %s1581_s6 }
 0x30f   : > { %v868_v33 = vsub.f32 1.5, %v867_v34 }
 0x310   : > { %v1116_v35 = vmul.f32 %v1964_v30, %v1115_v32 }
 0x311   : > { %v869_v36 = vmul.f32 %v1399_v25, %v868_v33 }
 0x312   : > { %v1117_v39 = vadd.f32 %v1971_v38, %v1116_v35 }
 0x313   : > { %v873_v18 = vsel %vm872_vm3, %v1399_v25, %v869_v36 }
 0x314   : > { %v1118_v54 = vmax.f32 %v1117_v39, 0.0  ;;  %v874_v37 = vmul.f32 %v873_v18, %v862_v40 }
 0x316   : > { %1120 = vrot.lane.b32.xlu1 %v1118_v54, %s1580_s5  ;;  %v875_v42 = vmul.f32 %v1964_v30, %v874_v37 }
 0x318   : > { %v876_v43 = vadd.f32 %v1971_v38, %v875_v42 }
 0x31a   : > { %v877_v9 = vmax.f32 %v876_v43, 0.0 }
 0x31c   : > { %879 = vrot.lane.b32.xlu0 %v877_v9, %s1582_s9 }
 0x337   : > { %978 = vadd.xlane.f32.xlu2 %v977_v48 }
 0x355   : > { %v634_v45 = vpop.permute.xlu2 %633 }
 0x356   : > { %637 = vst.msk [vmem:[%s1978_s17] sm:$0xff] %vm636_vm4, %v634_v45 }
 0x368   : > { %v757_v46 = vpop.permute.xlu2 %756 }
 0x369   : > { %760 = vst.msk [vmem:[%s1978_s17] sm:$0xff] %vm759_vm5, %v757_v46 }
 0x388   : > { %v1121_v0 = vpop.permute.xlu1 %1120 }
 0x38e   : > { %v880_v47 = vpop.permute.xlu0 %879 }
 0x38f   : > { %883 = vst.msk [vmem:[%s1978_s17] sm:$0xff] %vm882_vm6, %v880_v47 }
 0x3aa   : > { %v979_v53 = vpop.xlane.xlu2 %978 }
 0x3ab   : > { %v981_v41 = vmul.f32 0.03125, %v979_v53 }
 0x3ad   : > { %v983_v55 = vsub.f32 %v981_v41, %v982_v2 }
 0x3af   : > { %v984_v56 = vmax.f32 %v983_v55, 0.0 }
 0x3b1   : > { %v986_v57 = vadd.f32 1e-05, %v984_v56 }
 0x3b3   : > { %1400 = vrsqrt.f32 %v986_v57  ;;  %vm993_vm8 = vweird.f32 %v986_v57 }
 0x3b9   : > { %v1401_v44 = vpop.eup %1400 }
 0x3ba   : > { %v988_v58 = vmul.f32 %v1401_v44, %v986_v57  ;;  %vm994_vm7 = vweird.f32 %v1401_v44 }
 0x3bb   : > { %vm995_vm9 = vmor %vm993_vm8, %vm994_vm7 }
 0x3bc   : > { %v989_v60 = vmul.f32 %v1401_v44, %v988_v58 }
 0x3be   : > { %v990_v61 = vmul.f32 0.5, %v989_v60 }
 0x3c0   : > { %v991_v1 = vsub.f32 1.5, %v990_v61 }
 0x3c2   : > { %v992_v3 = vmul.f32 %v1401_v44, %v991_v1 }
 0x3c4   : > { %v996_v6 = vsel %vm995_vm9, %v1401_v44, %v992_v3 }
 0x3c5   : > { %v997_v7 = vmul.f32 %v996_v6, %v985_v5 }
 0x3c7   : > { %v998_v11 = vmul.f32 %v1964_v30, %v997_v7 }
 0x3c9   : > { %v999_v10 = vadd.f32 %v1971_v38, %v998_v11 }
 0x3cb   : > { %v1000_v12 = vmax.f32 %v999_v10, 0.0 }
 0x3cd   : > { %1001 = vst.msk [vmem:[%s1978_s17 + $0x8] sm:$0xff] %vm366_vm0, %v1000_v12 }
 0x3ce   : > { %1123 = vst.msk [vmem:[%s1978_s17 + $0x8] sm:$0xff] %vm636_vm4, %v1121_v0 }
 0x3cf   : > { %1519 = shalt.err (!%p1516_p9)
}
 0x3d0   : > { %1284 = dma.vmem_to_hbm [thread:$0]  (%p1691_p2), %s1139_s19, 256, %s1141_s22, %s1125_s8  }
 0x3d1 PF: > { %p1306_p10 = scmp.ge.s32.totalorder %s1562_s27, 2  ;;  %s1152_s30 = sand.u32 1, %s1550_s24  }
 0x3d2   : > { %s1153_s17 = scalar_lea.sflag [#allocation4], %s1152_s30 }
 0x3d3   : > { %p1298_p12 = pnand %p1306_p10, %p1695_p4 }
 0x3d5   : > { %p1299_p13 = pneg %p1298_p12 }
 0x3d7   : > { %1545 = dma.done.wait (%p1299_p13), %s1153_s17, 256  }
 0x3d8   : > { %1547 = vsyncadd (%p1299_p13), %s1153_s17, 4294967040  ;;  %p21_p0 = scmp.ge.s32.totalorder %s1665_s20, 5   ;;  %s2062_s24 = smov %s1554_s25 }
 0x3d9   : > { %s2063_s25 = smov %s1558_s26  ;;  %s2064_s26 = smov %s1676_s23 }
 0x3da   : > { %s2065_s27 = smov %s1665_s20  ;;  %23 = sbr.rel (!%p21_p0) target bundleno = 9 (0x9), region = 104 }
 0x3df   :  { %1159 = vsyncpa [#allocation3], 1 }
 0x3e0   :  { %1161 = vsyncpa [#allocation3 + $0x1], 1 }
 0x3e1   :  { %1162 = vsyncpa [#allocation6], 1 }
 0x3e2   :  { %1163 = vsyncpa [#allocation4], 1 }
 0x3e3   :  { %1165 = vsyncpa [#allocation4 + $0x1], 1 }

</bundles_post_ra>
